<compile_context>
chip_gen: v6e
topology: v6e:2x2x1
jax: 0.10.0
libtpu: 0.0.40
codegen_flags: <defaults>
</compile_context>

<pallas_src>
import math

import jax
import jax.numpy as jnp
from jax.experimental import pallas as pl
from jax.experimental.pallas import tpu as pltpu

# ----------------------- toy ViT config (ViT-B/16 shape-alike) -----------------------
PATCH = 16
IMG = 32                      # 32x32 image -> 2x2 = 4 patches
CHANNELS = 3
HIDDEN = 64                   # D
HEADS = 4
HEAD_DIM = HIDDEN // HEADS
MLP = 128
LAYERS = 2
EPS = 1e-6                    # torchvision ViT LayerNorm eps
B = 2
N_PATCH = (IMG // PATCH) ** 2
SEQ = N_PATCH + 1             # +1 class token
CPP = CHANNELS * PATCH * PATCH


# ------------------------------- in-kernel helpers ------------------------------------
def _layernorm(x, w, b):
    mu = jnp.mean(x, axis=-1, keepdims=True)
    var = jnp.mean(jnp.square(x - mu), axis=-1, keepdims=True)
    return (x - mu) * jax.lax.rsqrt(var + EPS) * w + b


def _erf(x):
    # Abramowitz & Stegun 7.1.26 rational approximation, |error| <= 1.5e-7.
    # The 1/(1+p*|x|) divide goes to the EUP reciprocal slot (approx error << 1.5e-7),
    # keeping it off the long-latency VALU divide path (matters most on v5e).
    a1, a2, a3, a4, a5 = 0.254829592, -0.284496736, 1.421413741, -1.453152027, 1.061405429
    p = 0.3275911
    ax = jnp.abs(x)
    t = pl.reciprocal(1.0 + p * ax, approx=True)
    poly = ((((a5 * t + a4) * t + a3) * t + a2) * t + a1) * t
    y = 1.0 - poly * jnp.exp(-ax * ax)
    return jnp.where(x >= 0, y, -y)


def _gelu_erf(x):
    return 0.5 * x * (1.0 + _erf(x * (1.0 / math.sqrt(2.0))))


# ------------------------------- fused ViT kernel --------------------------------------
def _vit_kernel(
    patches_ref,          # (1, SEQ, CPP) bf16  this image's patches (row 0 is zeros: cls)
    w_patch_ref,          # (CPP, D)      bf16
    add_emb_ref,          # (SEQ, D)      f32   conv bias + pos (+ cls token on row 0)
    ln1w_ref, ln1b_ref,   # (L, 1, D)     f32
    wqkv_ref,             # (L, D, 3D)    bf16  (Q columns pre-scaled by 1/sqrt(head_dim))
    bqkv_ref,             # (L, 1, 3D)    f32
    wo_ref, bo_ref,       # (L, D, D) bf16 / (L, 1, D) f32
    ln2w_ref, ln2b_ref,   # (L, 1, D)     f32
    w1_ref, b1_ref,       # (L, D, MLP) bf16 / (L, 1, MLP) f32
    w2_ref, b2_ref,       # (L, MLP, D) bf16 / (L, 1, D) f32
    lnfw_ref, lnfb_ref,   # (1, D)        f32
    o_ref,                # (1, 1, D)     f32
):
    # --- patch embedding + class-token / positional embedding --------------------------
    # Row 0 of `patches` is zero and `add_emb` carries conv bias, positional embedding
    # and (on row 0) the learned class token, so this is exact.
    x = jnp.dot(patches_ref[0], w_patch_ref[...],
                preferred_element_type=jnp.float32) + add_emb_ref[...]      # (SEQ, D) f32

    def layer(l, x):
        # ---------------- LayerNorm 1 + fused QKV projection ----------------
        xn = _layernorm(x, ln1w_ref[l], ln1b_ref[l])
        qkv = jnp.dot(xn.astype(jnp.bfloat16), wqkv_ref[l],
                      preferred_element_type=jnp.float32) + bqkv_ref[l]     # (S, 3D)
        # 1/sqrt(head_dim) already folded into the Q projection on the host.
        q = qkv[:, 0:HIDDEN].astype(jnp.bfloat16)
        k = qkv[:, HIDDEN:2 * HIDDEN].astype(jnp.bfloat16)
        v = qkv[:, 2 * HIDDEN:3 * HIDDEN].astype(jnp.bfloat16)

        # ---------------- multi-head self-attention (per image, no mask) ----------
        # Per-head QK^T dots, then ONE batched softmax over the stacked (H, S, S) slab
        # (single max / exp / sum / reciprocal chain instead of four).
        scores = []
        for h in range(HEADS):                      # static 4-way unroll
            lo = h * HEAD_DIM
            scores.append(jax.lax.dot_general(      # (S, S) = qh @ kh^T
                q[:, lo:lo + HEAD_DIM], k[:, lo:lo + HEAD_DIM],
                (((1,), (1,)), ((), ())), preferred_element_type=jnp.float32))
        s = jnp.stack(scores, axis=0)                                       # (H, S, S)
        s = s - jnp.max(s, axis=-1, keepdims=True)
        p = jnp.exp(s)
        # NOTE: approx=True EUP reciprocal; flip to approx=False for bit-level parity
        # with torch softmax (cheap at these sizes).
        p = (p * pl.reciprocal(jnp.sum(p, axis=-1, keepdims=True), approx=True)
             ).astype(jnp.bfloat16)

        heads = []
        for h in range(HEADS):
            lo = h * HEAD_DIM
            heads.append(jnp.dot(p[h], v[:, lo:lo + HEAD_DIM],
                                 preferred_element_type=jnp.float32))       # (S, hd)
        attn = jnp.concatenate(heads, axis=-1)                              # (S, D)
        attn = jnp.dot(attn.astype(jnp.bfloat16), wo_ref[l],
                       preferred_element_type=jnp.float32) + bo_ref[l]      # single Wo dot
        x = x + attn                                                        # residual 1

        # ---------------- LayerNorm 2 + MLP (exact erf-GELU) ----------------
        x2 = _layernorm(x, ln2w_ref[l], ln2b_ref[l])
        h1 = jnp.dot(x2.astype(jnp.bfloat16), w1_ref[l],
                     preferred_element_type=jnp.float32) + b1_ref[l]
        h1 = _gelu_erf(h1)
        h2 = jnp.dot(h1.astype(jnp.bfloat16), w2_ref[l],
                     preferred_element_type=jnp.float32) + b2_ref[l]
        return x + h2                                                       # residual 2

    x = jax.lax.fori_loop(0, LAYERS, layer, x, unroll=True)

    # --- final LayerNorm on the class token (LN is per-token), single dense store ------
    o_ref[0] = _layernorm(x[0:1, :], lnfw_ref[...], lnfb_ref[...])


# ------------------------------- host-side glue ----------------------------------------
def patchify(images):
    # NCHW -> (B, N_patches, C*P*P), patch features flattened (C, ph, pw)-major to
    # match flattening a PyTorch conv weight of shape (D, C, P, P).
    bn, c, h, w = images.shape
    hp, wp = h // PATCH, w // PATCH
    x = images.reshape(bn, c, hp, PATCH, wp, PATCH)
    x = x.transpose(0, 2, 4, 1, 3, 5)              # (B, hp, wp, C, P, P)
    return x.reshape(bn, hp * wp, c * PATCH * PATCH)


def prepare_params(params):
    """One-time prep: stack per-layer weights along a LAYERS axis, fold the attention
    scale into the Q projection, cast MXU operands to bf16 (biases / LN params stay f32),
    and fuse conv bias + class token + positional embedding into one (SEQ, D) row table."""
    scale = 1.0 / math.sqrt(HEAD_DIM)
    qkv_scale = jnp.concatenate(
        [jnp.full((HIDDEN,), scale, jnp.float32), jnp.ones((2 * HIDDEN,), jnp.float32)])

    def stack(name):
        return jnp.stack([lp[name] for lp in params["layers"]])

    row_add = jnp.concatenate(
        [params["cls"][0] + params["pos"][0, 0:1],              # class-token row
         params["b_patch"] + params["pos"][0, 1:]], axis=0)     # patch rows -> (SEQ, D)

    # TODO(synk): at real ViT-B scale (D=768, 12 layers) the keep-all-weights-resident
    # layout must become a grid=(LAYERS,) "arbitrary" axis with per-layer weight
    # BlockSpecs (index_map lambda l: (l, 0, 0), pipeline_mode=pl.Buffered(2)) and the
    # activation slab held in VMEM scratch, so one layer's weights stream while the
    # previous layer computes and the footprint fits v7x's 64 MiB VMEM.
    return {
        "w_patch": params["w_patch"].astype(jnp.bfloat16),
        "row_add": row_add,
        "ln1_w": stack("ln1_w"), "ln1_b": stack("ln1_b"),
        "wqkv": (stack("wqkv") * qkv_scale).astype(jnp.bfloat16),
        "bqkv": stack("bqkv") * qkv_scale,
        "wo": stack("wo").astype(jnp.bfloat16), "bo": stack("bo"),
        "ln2_w": stack("ln2_w"), "ln2_b": stack("ln2_b"),
        "w1": stack("w1").astype(jnp.bfloat16), "b1": stack("b1"),
        "w2": stack("w2").astype(jnp.bfloat16), "b2": stack("b2"),
        "ln_f_w": params["ln_f_w"], "ln_f_b": params["ln_f_b"],
    }


def vision_encoder_forward(images, prep):
    bn = images.shape[0]

    patches = patchify(images)                                           # (B, N, CPP)
    zeros = jnp.zeros((bn, 1, CPP), patches.dtype)                       # cls "patch" row
    patches_full = jnp.concatenate([zeros, patches], axis=1).astype(jnp.bfloat16)

    args = (patches_full, prep["w_patch"], prep["row_add"],
            prep["ln1_w"], prep["ln1_b"], prep["wqkv"], prep["bqkv"],
            prep["wo"], prep["bo"], prep["ln2_w"], prep["ln2_b"],
            prep["w1"], prep["b1"], prep["w2"], prep["b2"],
            prep["ln_f_w"], prep["ln_f_b"])

    # Weights: full-shape blocks with a constant index_map -> resident across the batch
    # grid, no re-DMA per image.  Only the patches (and output) advance with the grid.
    def const_spec(a):
        nd = a.ndim
        return pl.BlockSpec(a.shape, lambda b, _nd=nd: (0,) * _nd)

    in_specs = ([pl.BlockSpec((1, SEQ, CPP), lambda b: (b, 0, 0))]
                + [const_spec(a) for a in args[1:]])

    # Advisory cost for XLA's scheduler.
    flops = bn * (2 * SEQ * CPP * HIDDEN + LAYERS * (
        2 * SEQ * HIDDEN * 3 * HIDDEN          # QKV projection
        + 4 * SEQ * SEQ * HIDDEN               # QK^T + PV (all heads)
        + 2 * SEQ * HIDDEN * HIDDEN            # Wo
        + 4 * SEQ * HIDDEN * MLP))             # MLP up + down
    transcendentals = bn * LAYERS * (HEADS * SEQ * SEQ + 2 * SEQ * MLP)
    bytes_accessed = (sum(int(a.size) * a.dtype.itemsize for a in args)
                      + bn * HIDDEN * 4)

    out = pl.pallas_call(
        _vit_kernel,
        out_shape=jax.ShapeDtypeStruct((bn, 1, HIDDEN), jnp.float32),
        grid_spec=pltpu.PrefetchScalarGridSpec(
            num_scalar_prefetch=0,
            grid=(bn,),
            in_specs=in_specs,
            out_specs=pl.BlockSpec((1, 1, HIDDEN), lambda b: (b, 0, 0)),
        ),
        compiler_params=pltpu.CompilerParams(
            dimension_semantics=("parallel",),          # shard images across TCs (v7x)
            vmem_limit_bytes=4 * 1024 * 1024),          # actual footprint ~1 MiB
        cost_estimate=pl.CostEstimate(
            flops=flops, transcendentals=transcendentals, bytes_accessed=bytes_accessed),
    )(*args)
    return out.reshape(bn, HIDDEN)


# ------------------------------- deterministic params ----------------------------------
def init_params(key):
    ks = jax.random.split(key, 3 + LAYERS)

    def nrm(k, shape, scale=0.02):
        return scale * jax.random.normal(k, shape, jnp.float32)

    params = {
        "w_patch": nrm(ks[0], (CPP, HIDDEN)),
        "b_patch": jnp.zeros((1, HIDDEN), jnp.float32),
        "cls": nrm(ks[1], (1, 1, HIDDEN)),
        "pos": nrm(ks[2], (1, SEQ, HIDDEN)),
        "ln_f_w": jnp.ones((1, HIDDEN), jnp.float32),
        "ln_f_b": jnp.zeros((1, HIDDEN), jnp.float32),
        "layers": [],
    }
    for i in range(LAYERS):
        lk = jax.random.split(ks[3 + i], 4)
        params["layers"].append({
            "ln1_w": jnp.ones((1, HIDDEN), jnp.float32),
            "ln1_b": jnp.zeros((1, HIDDEN), jnp.float32),
            "wqkv": nrm(lk[0], (HIDDEN, 3 * HIDDEN)),
            "bqkv": jnp.zeros((1, 3 * HIDDEN), jnp.float32),
            "wo": nrm(lk[1], (HIDDEN, HIDDEN)),
            "bo": jnp.zeros((1, HIDDEN), jnp.float32),
            "ln2_w": jnp.ones((1, HIDDEN), jnp.float32),
            "ln2_b": jnp.zeros((1, HIDDEN), jnp.float32),
            "w1": nrm(lk[2], (HIDDEN, MLP)),
            "b1": jnp.zeros((1, MLP), jnp.float32),
            "w2": nrm(lk[3], (MLP, HIDDEN)),
            "b2": jnp.zeros((1, HIDDEN), jnp.float32),
        })
    return params


if __name__ == "__main__":
    key = jax.random.PRNGKey(0)
    k_img, k_par = jax.random.split(key)
    images = jax.random.normal(k_img, (B, CHANNELS, IMG, IMG), jnp.float32)
    params = init_params(k_par)
    prep = prepare_params(params)

    out = jax.jit(vision_encoder_forward)(images, prep)
    out = jax.block_until_ready(out)

    assert out.shape == (B, HIDDEN), out.shape
    assert bool(jnp.all(jnp.isfinite(out)))
    print("KERNEL_OK")
</pallas_src>

<mosaic_0001>
module attributes {stable_mosaic.version = 11 : i64} {
  func.func @_vit_kernel(%arg0: i32, %arg1: memref<1x5x768xbf16, #tpu.memory_space<vmem>>, %arg2: memref<768x64xbf16, #tpu.memory_space<vmem>>, %arg3: memref<5x64xf32, #tpu.memory_space<vmem>>, %arg4: memref<2x1x64xf32, #tpu.memory_space<vmem>>, %arg5: memref<2x1x64xf32, #tpu.memory_space<vmem>>, %arg6: memref<2x64x192xbf16, #tpu.memory_space<vmem>>, %arg7: memref<2x1x192xf32, #tpu.memory_space<vmem>>, %arg8: memref<2x64x64xbf16, #tpu.memory_space<vmem>>, %arg9: memref<2x1x64xf32, #tpu.memory_space<vmem>>, %arg10: memref<2x1x64xf32, #tpu.memory_space<vmem>>, %arg11: memref<2x1x64xf32, #tpu.memory_space<vmem>>, %arg12: memref<2x64x128xbf16, #tpu.memory_space<vmem>>, %arg13: memref<2x1x128xf32, #tpu.memory_space<vmem>>, %arg14: memref<2x128x64xbf16, #tpu.memory_space<vmem>>, %arg15: memref<2x1x64xf32, #tpu.memory_space<vmem>>, %arg16: memref<1x64xf32, #tpu.memory_space<vmem>>, %arg17: memref<1x64xf32, #tpu.memory_space<vmem>>, %arg18: memref<1x1x64xf32, #tpu.memory_space<vmem>>) attributes {dimension_semantics = [#tpu.dimension_semantics<parallel>], iteration_bounds = array<i64: 2>, scalar_prefetch = 0 : i64, scratch_operands = 0 : i64, tpu.core_type = #tpu.core_type<tc>, window_params = [{transform_indices = @transform_0, window_bounds = array<i64: 1, 5, 768>}, {pipeline_mode = #tpu.pipeline_mode<synchronous>, transform_indices = @transform_1, window_bounds = array<i64: 768, 64>}, {pipeline_mode = #tpu.pipeline_mode<synchronous>, transform_indices = @transform_2, window_bounds = array<i64: 5, 64>}, {pipeline_mode = #tpu.pipeline_mode<synchronous>, transform_indices = @transform_3, window_bounds = array<i64: 2, 1, 64>}, {pipeline_mode = #tpu.pipeline_mode<synchronous>, transform_indices = @transform_4, window_bounds = array<i64: 2, 1, 64>}, {pipeline_mode = #tpu.pipeline_mode<synchronous>, transform_indices = @transform_5, window_bounds = array<i64: 2, 64, 192>}, {pipeline_mode = #tpu.pipeline_mode<synchronous>, transform_indices = @transform_6, window_bounds = array<i64: 2, 1, 192>}, {pipeline_mode = #tpu.pipeline_mode<synchronous>, transform_indices = @transform_7, window_bounds = array<i64: 2, 64, 64>}, {pipeline_mode = #tpu.pipeline_mode<synchronous>, transform_indices = @transform_8, window_bounds = array<i64: 2, 1, 64>}, {pipeline_mode = #tpu.pipeline_mode<synchronous>, transform_indices = @transform_9, window_bounds = array<i64: 2, 1, 64>}, {pipeline_mode = #tpu.pipeline_mode<synchronous>, transform_indices = @transform_10, window_bounds = array<i64: 2, 1, 64>}, {pipeline_mode = #tpu.pipeline_mode<synchronous>, transform_indices = @transform_11, window_bounds = array<i64: 2, 64, 128>}, {pipeline_mode = #tpu.pipeline_mode<synchronous>, transform_indices = @transform_12, window_bounds = array<i64: 2, 1, 128>}, {pipeline_mode = #tpu.pipeline_mode<synchronous>, transform_indices = @transform_13, window_bounds = array<i64: 2, 128, 64>}, {pipeline_mode = #tpu.pipeline_mode<synchronous>, transform_indices = @transform_14, window_bounds = array<i64: 2, 1, 64>}, {pipeline_mode = #tpu.pipeline_mode<synchronous>, transform_indices = @transform_15, window_bounds = array<i64: 1, 64>}, {pipeline_mode = #tpu.pipeline_mode<synchronous>, transform_indices = @transform_16, window_bounds = array<i64: 1, 64>}, {transform_indices = @transform_17, window_bounds = array<i64: 1, 1, 64>}]} {
    %c0 = arith.constant 0 : index
    %c0_0 = arith.constant 0 : index
    %c0_1 = arith.constant 0 : index
    %0 = vector.load %arg1[%c0, %c0_0, %c0_1] : memref<1x5x768xbf16, #tpu.memory_space<vmem>>, vector<1x5x768xbf16>
    %1 = vector.shape_cast %0 : vector<1x5x768xbf16> to vector<5x768xbf16>
    %c0_2 = arith.constant 0 : index
    %c0_3 = arith.constant 0 : index
    %2 = vector.load %arg2[%c0_2, %c0_3] : memref<768x64xbf16, #tpu.memory_space<vmem>>, vector<768x64xbf16>
    %cst = arith.constant dense<0.000000e+00> : vector<5x64xf32>
    %3 = tpu.matmul %1, %2, %cst {dimension_numbers = #tpu.dot_dimension_numbers<[1], [0], [0], [1], [0, 0, 1, 1], [], []>} : vector<5x768xbf16>, vector<768x64xbf16>, vector<5x64xf32> -> vector<5x64xf32>
    %c0_4 = arith.constant 0 : index
    %c0_5 = arith.constant 0 : index
    %4 = vector.load %arg3[%c0_4, %c0_5] : memref<5x64xf32, #tpu.memory_space<vmem>>, vector<5x64xf32>
    %5 = arith.addf %3, %4 : vector<5x64xf32>
    %c0_i32 = arith.constant 0 : i32
    %6 = arith.index_cast %c0_i32 : i32 to index
    %c0_6 = arith.constant 0 : index
    %c0_7 = arith.constant 0 : index
    %7 = vector.load %arg4[%6, %c0_6, %c0_7] : memref<2x1x64xf32, #tpu.memory_space<vmem>>, vector<1x1x64xf32>
    %8 = vector.shape_cast %7 : vector<1x1x64xf32> to vector<1x64xf32>
    %9 = arith.index_cast %c0_i32 : i32 to index
    %c0_8 = arith.constant 0 : index
    %c0_9 = arith.constant 0 : index
    %10 = vector.load %arg5[%9, %c0_8, %c0_9] : memref<2x1x64xf32, #tpu.memory_space<vmem>>, vector<1x1x64xf32>
    %11 = vector.shape_cast %10 : vector<1x1x64xf32> to vector<1x64xf32>
    %cst_10 = arith.constant dense<0.000000e+00> : vector<5xf32>
    %12 = vector.multi_reduction <add>, %5, %cst_10 [1] : vector<5x64xf32> to vector<5xf32>
    %13 = vector.shape_cast %12 : vector<5xf32> to vector<5x1xf32>
    %cst_11 = arith.constant 6.400000e+01 : f32
    %14 = vector.broadcast %cst_11 : f32 to vector<5x1xf32>
    %15 = arith.divf %13, %14 : vector<5x1xf32>
    %16 = vector.broadcast %15 : vector<5x1xf32> to vector<5x64xf32>
    %17 = arith.subf %5, %16 : vector<5x64xf32>
    %18 = arith.mulf %17, %17 : vector<5x64xf32>
    %cst_12 = arith.constant dense<0.000000e+00> : vector<5xf32>
    %19 = vector.multi_reduction <add>, %18, %cst_12 [1] : vector<5x64xf32> to vector<5xf32>
    %20 = vector.shape_cast %19 : vector<5xf32> to vector<5x1xf32>
    %cst_13 = arith.constant 6.400000e+01 : f32
    %21 = vector.broadcast %cst_13 : f32 to vector<5x1xf32>
    %22 = arith.divf %20, %21 : vector<5x1xf32>
    %23 = vector.broadcast %15 : vector<5x1xf32> to vector<5x64xf32>
    %24 = arith.subf %5, %23 : vector<5x64xf32>
    %cst_14 = arith.constant 9.99999997E-7 : f32
    %25 = vector.broadcast %cst_14 : f32 to vector<5x1xf32>
    %26 = arith.addf %22, %25 : vector<5x1xf32>
    %27 = math.rsqrt %26 : vector<5x1xf32>
    %28 = vector.broadcast %27 : vector<5x1xf32> to vector<5x64xf32>
    %29 = arith.mulf %24, %28 : vector<5x64xf32>
    %30 = vector.broadcast %8 : vector<1x64xf32> to vector<5x64xf32>
    %31 = arith.mulf %29, %30 : vector<5x64xf32>
    %32 = vector.broadcast %11 : vector<1x64xf32> to vector<5x64xf32>
    %33 = arith.addf %31, %32 : vector<5x64xf32>
    %34 = arith.truncf %33 : vector<5x64xf32> to vector<5x64xbf16>
    %35 = arith.index_cast %c0_i32 : i32 to index
    %c0_15 = arith.constant 0 : index
    %c0_16 = arith.constant 0 : index
    %36 = vector.load %arg6[%35, %c0_15, %c0_16] : memref<2x64x192xbf16, #tpu.memory_space<vmem>>, vector<1x64x192xbf16>
    %37 = vector.shape_cast %36 : vector<1x64x192xbf16> to vector<64x192xbf16>
    %cst_17 = arith.constant dense<0.000000e+00> : vector<5x192xf32>
    %38 = tpu.matmul %34, %37, %cst_17 {dimension_numbers = #tpu.dot_dimension_numbers<[1], [0], [0], [1], [0, 0, 1, 1], [], []>} : vector<5x64xbf16>, vector<64x192xbf16>, vector<5x192xf32> -> vector<5x192xf32>
    %39 = arith.index_cast %c0_i32 : i32 to index
    %c0_18 = arith.constant 0 : index
    %c0_19 = arith.constant 0 : index
    %40 = vector.load %arg7[%39, %c0_18, %c0_19] : memref<2x1x192xf32, #tpu.memory_space<vmem>>, vector<1x1x192xf32>
    %41 = vector.shape_cast %40 : vector<1x1x192xf32> to vector<1x192xf32>
    %42 = vector.broadcast %41 : vector<1x192xf32> to vector<5x192xf32>
    %43 = arith.addf %38, %42 : vector<5x192xf32>
    %44 = vector.extract_strided_slice %43 {offsets = [0, 0], sizes = [5, 64], strides = [1, 1]} : vector<5x192xf32> to vector<5x64xf32>
    %45 = arith.truncf %44 : vector<5x64xf32> to vector<5x64xbf16>
    %46 = vector.extract_strided_slice %43 {offsets = [0, 64], sizes = [5, 64], strides = [1, 1]} : vector<5x192xf32> to vector<5x64xf32>
    %47 = arith.truncf %46 : vector<5x64xf32> to vector<5x64xbf16>
    %48 = vector.extract_strided_slice %43 {offsets = [0, 128], sizes = [5, 64], strides = [1, 1]} : vector<5x192xf32> to vector<5x64xf32>
    %49 = arith.truncf %48 : vector<5x64xf32> to vector<5x64xbf16>
    %50 = vector.extract_strided_slice %45 {offsets = [0, 0], sizes = [5, 16], strides = [1, 1]} : vector<5x64xbf16> to vector<5x16xbf16>
    %51 = vector.extract_strided_slice %47 {offsets = [0, 0], sizes = [5, 16], strides = [1, 1]} : vector<5x64xbf16> to vector<5x16xbf16>
    %cst_20 = arith.constant dense<0.000000e+00> : vector<5x5xf32>
    %52 = tpu.matmul %50, %51, %cst_20 {dimension_numbers = #tpu.dot_dimension_numbers<[1], [1], [0], [0], [0, 0, 1, 0], [], []>} : vector<5x16xbf16>, vector<5x16xbf16>, vector<5x5xf32> -> vector<5x5xf32>
    %53 = vector.extract_strided_slice %45 {offsets = [0, 16], sizes = [5, 16], strides = [1, 1]} : vector<5x64xbf16> to vector<5x16xbf16>
    %54 = vector.extract_strided_slice %47 {offsets = [0, 16], sizes = [5, 16], strides = [1, 1]} : vector<5x64xbf16> to vector<5x16xbf16>
    %cst_21 = arith.constant dense<0.000000e+00> : vector<5x5xf32>
    %55 = tpu.matmul %53, %54, %cst_21 {dimension_numbers = #tpu.dot_dimension_numbers<[1], [1], [0], [0], [0, 0, 1, 0], [], []>} : vector<5x16xbf16>, vector<5x16xbf16>, vector<5x5xf32> -> vector<5x5xf32>
    %56 = vector.extract_strided_slice %45 {offsets = [0, 32], sizes = [5, 16], strides = [1, 1]} : vector<5x64xbf16> to vector<5x16xbf16>
    %57 = vector.extract_strided_slice %47 {offsets = [0, 32], sizes = [5, 16], strides = [1, 1]} : vector<5x64xbf16> to vector<5x16xbf16>
    %cst_22 = arith.constant dense<0.000000e+00> : vector<5x5xf32>
    %58 = tpu.matmul %56, %57, %cst_22 {dimension_numbers = #tpu.dot_dimension_numbers<[1], [1], [0], [0], [0, 0, 1, 0], [], []>} : vector<5x16xbf16>, vector<5x16xbf16>, vector<5x5xf32> -> vector<5x5xf32>
    %59 = vector.extract_strided_slice %45 {offsets = [0, 48], sizes = [5, 16], strides = [1, 1]} : vector<5x64xbf16> to vector<5x16xbf16>
    %60 = vector.extract_strided_slice %47 {offsets = [0, 48], sizes = [5, 16], strides = [1, 1]} : vector<5x64xbf16> to vector<5x16xbf16>
    %cst_23 = arith.constant dense<0.000000e+00> : vector<5x5xf32>
    %61 = tpu.matmul %59, %60, %cst_23 {dimension_numbers = #tpu.dot_dimension_numbers<[1], [1], [0], [0], [0, 0, 1, 0], [], []>} : vector<5x16xbf16>, vector<5x16xbf16>, vector<5x5xf32> -> vector<5x5xf32>
    %62 = vector.shape_cast %52 : vector<5x5xf32> to vector<1x5x5xf32>
    %63 = vector.shape_cast %55 : vector<5x5xf32> to vector<1x5x5xf32>
    %64 = vector.shape_cast %58 : vector<5x5xf32> to vector<1x5x5xf32>
    %65 = vector.shape_cast %61 : vector<5x5xf32> to vector<1x5x5xf32>
    %66 = tpu.concatenate %62, %63, %64, %65 in 0 : vector<1x5x5xf32>, vector<1x5x5xf32>, vector<1x5x5xf32>, vector<1x5x5xf32> -> vector<4x5x5xf32>
    %cst_24 = arith.constant dense<0xFF800000> : vector<4x5xf32>
    %67 = vector.multi_reduction <maximumf>, %66, %cst_24 [2] : vector<4x5x5xf32> to vector<4x5xf32>
    %68 = vector.shape_cast %67 : vector<4x5xf32> to vector<4x5x1xf32>
    %69 = vector.broadcast %68 : vector<4x5x1xf32> to vector<4x5x5xf32>
    %70 = arith.subf %66, %69 : vector<4x5x5xf32>
    %71 = math.exp %70 : vector<4x5x5xf32>
    %cst_25 = arith.constant dense<0.000000e+00> : vector<4x5xf32>
    %72 = vector.multi_reduction <add>, %71, %cst_25 [2] : vector<4x5x5xf32> to vector<4x5xf32>
    %73 = vector.shape_cast %72 : vector<4x5xf32> to vector<4x5x1xf32>
    %74 = tpu.reciprocal %73 {approx = true} : vector<4x5x1xf32> -> vector<4x5x1xf32>
    %75 = vector.broadcast %74 : vector<4x5x1xf32> to vector<4x5x5xf32>
    %76 = arith.mulf %71, %75 : vector<4x5x5xf32>
    %77 = arith.truncf %76 : vector<4x5x5xf32> to vector<4x5x5xbf16>
    %78 = vector.extract_strided_slice %77 {offsets = [0, 0, 0], sizes = [1, 5, 5], strides = [1, 1, 1]} : vector<4x5x5xbf16> to vector<1x5x5xbf16>
    %79 = vector.shape_cast %78 : vector<1x5x5xbf16> to vector<5x5xbf16>
    %80 = vector.extract_strided_slice %49 {offsets = [0, 0], sizes = [5, 16], strides = [1, 1]} : vector<5x64xbf16> to vector<5x16xbf16>
    %cst_26 = arith.constant dense<0.000000e+00> : vector<5x16xf32>
    %81 = tpu.matmul %79, %80, %cst_26 {dimension_numbers = #tpu.dot_dimension_numbers<[1], [0], [0], [1], [0, 0, 1, 1], [], []>} : vector<5x5xbf16>, vector<5x16xbf16>, vector<5x16xf32> -> vector<5x16xf32>
    %82 = vector.extract_strided_slice %77 {offsets = [1, 0, 0], sizes = [1, 5, 5], strides = [1, 1, 1]} : vector<4x5x5xbf16> to vector<1x5x5xbf16>
    %83 = vector.shape_cast %82 : vector<1x5x5xbf16> to vector<5x5xbf16>
    %84 = vector.extract_strided_slice %49 {offsets = [0, 16], sizes = [5, 16], strides = [1, 1]} : vector<5x64xbf16> to vector<5x16xbf16>
    %cst_27 = arith.constant dense<0.000000e+00> : vector<5x16xf32>
    %85 = tpu.matmul %83, %84, %cst_27 {dimension_numbers = #tpu.dot_dimension_numbers<[1], [0], [0], [1], [0, 0, 1, 1], [], []>} : vector<5x5xbf16>, vector<5x16xbf16>, vector<5x16xf32> -> vector<5x16xf32>
    %86 = vector.extract_strided_slice %77 {offsets = [2, 0, 0], sizes = [1, 5, 5], strides = [1, 1, 1]} : vector<4x5x5xbf16> to vector<1x5x5xbf16>
    %87 = vector.shape_cast %86 : vector<1x5x5xbf16> to vector<5x5xbf16>
    %88 = vector.extract_strided_slice %49 {offsets = [0, 32], sizes = [5, 16], strides = [1, 1]} : vector<5x64xbf16> to vector<5x16xbf16>
    %cst_28 = arith.constant dense<0.000000e+00> : vector<5x16xf32>
    %89 = tpu.matmul %87, %88, %cst_28 {dimension_numbers = #tpu.dot_dimension_numbers<[1], [0], [0], [1], [0, 0, 1, 1], [], []>} : vector<5x5xbf16>, vector<5x16xbf16>, vector<5x16xf32> -> vector<5x16xf32>
    %90 = vector.extract_strided_slice %77 {offsets = [3, 0, 0], sizes = [1, 5, 5], strides = [1, 1, 1]} : vector<4x5x5xbf16> to vector<1x5x5xbf16>
    %91 = vector.shape_cast %90 : vector<1x5x5xbf16> to vector<5x5xbf16>
    %92 = vector.extract_strided_slice %49 {offsets = [0, 48], sizes = [5, 16], strides = [1, 1]} : vector<5x64xbf16> to vector<5x16xbf16>
    %cst_29 = arith.constant dense<0.000000e+00> : vector<5x16xf32>
    %93 = tpu.matmul %91, %92, %cst_29 {dimension_numbers = #tpu.dot_dimension_numbers<[1], [0], [0], [1], [0, 0, 1, 1], [], []>} : vector<5x5xbf16>, vector<5x16xbf16>, vector<5x16xf32> -> vector<5x16xf32>
    %94 = tpu.concatenate %81, %85, %89, %93 in 1 : vector<5x16xf32>, vector<5x16xf32>, vector<5x16xf32>, vector<5x16xf32> -> vector<5x64xf32>
    %95 = arith.truncf %94 : vector<5x64xf32> to vector<5x64xbf16>
    %96 = arith.index_cast %c0_i32 : i32 to index
    %c0_30 = arith.constant 0 : index
    %c0_31 = arith.constant 0 : index
    %97 = vector.load %arg8[%96, %c0_30, %c0_31] : memref<2x64x64xbf16, #tpu.memory_space<vmem>>, vector<1x64x64xbf16>
    %98 = vector.shape_cast %97 : vector<1x64x64xbf16> to vector<64x64xbf16>
    %cst_32 = arith.constant dense<0.000000e+00> : vector<5x64xf32>
    %99 = tpu.matmul %95, %98, %cst_32 {dimension_numbers = #tpu.dot_dimension_numbers<[1], [0], [0], [1], [0, 0, 1, 1], [], []>} : vector<5x64xbf16>, vector<64x64xbf16>, vector<5x64xf32> -> vector<5x64xf32>
    %100 = arith.index_cast %c0_i32 : i32 to index
    %c0_33 = arith.constant 0 : index
    %c0_34 = arith.constant 0 : index
    %101 = vector.load %arg9[%100, %c0_33, %c0_34] : memref<2x1x64xf32, #tpu.memory_space<vmem>>, vector<1x1x64xf32>
    %102 = vector.shape_cast %101 : vector<1x1x64xf32> to vector<1x64xf32>
    %103 = vector.broadcast %102 : vector<1x64xf32> to vector<5x64xf32>
    %104 = arith.addf %99, %103 : vector<5x64xf32>
    %105 = arith.addf %5, %104 : vector<5x64xf32>
    %106 = arith.index_cast %c0_i32 : i32 to index
    %c0_35 = arith.constant 0 : index
    %c0_36 = arith.constant 0 : index
    %107 = vector.load %arg10[%106, %c0_35, %c0_36] : memref<2x1x64xf32, #tpu.memory_space<vmem>>, vector<1x1x64xf32>
    %108 = vector.shape_cast %107 : vector<1x1x64xf32> to vector<1x64xf32>
    %109 = arith.index_cast %c0_i32 : i32 to index
    %c0_37 = arith.constant 0 : index
    %c0_38 = arith.constant 0 : index
    %110 = vector.load %arg11[%109, %c0_37, %c0_38] : memref<2x1x64xf32, #tpu.memory_space<vmem>>, vector<1x1x64xf32>
    %111 = vector.shape_cast %110 : vector<1x1x64xf32> to vector<1x64xf32>
    %cst_39 = arith.constant dense<0.000000e+00> : vector<5xf32>
    %112 = vector.multi_reduction <add>, %105, %cst_39 [1] : vector<5x64xf32> to vector<5xf32>
    %113 = vector.shape_cast %112 : vector<5xf32> to vector<5x1xf32>
    %cst_40 = arith.constant 6.400000e+01 : f32
    %114 = vector.broadcast %cst_40 : f32 to vector<5x1xf32>
    %115 = arith.divf %113, %114 : vector<5x1xf32>
    %116 = vector.broadcast %115 : vector<5x1xf32> to vector<5x64xf32>
    %117 = arith.subf %105, %116 : vector<5x64xf32>
    %118 = arith.mulf %117, %117 : vector<5x64xf32>
    %cst_41 = arith.constant dense<0.000000e+00> : vector<5xf32>
    %119 = vector.multi_reduction <add>, %118, %cst_41 [1] : vector<5x64xf32> to vector<5xf32>
    %120 = vector.shape_cast %119 : vector<5xf32> to vector<5x1xf32>
    %cst_42 = arith.constant 6.400000e+01 : f32
    %121 = vector.broadcast %cst_42 : f32 to vector<5x1xf32>
    %122 = arith.divf %120, %121 : vector<5x1xf32>
    %123 = vector.broadcast %115 : vector<5x1xf32> to vector<5x64xf32>
    %124 = arith.subf %105, %123 : vector<5x64xf32>
    %cst_43 = arith.constant 9.99999997E-7 : f32
    %125 = vector.broadcast %cst_43 : f32 to vector<5x1xf32>
    %126 = arith.addf %122, %125 : vector<5x1xf32>
    %127 = math.rsqrt %126 : vector<5x1xf32>
    %128 = vector.broadcast %127 : vector<5x1xf32> to vector<5x64xf32>
    %129 = arith.mulf %124, %128 : vector<5x64xf32>
    %130 = vector.broadcast %108 : vector<1x64xf32> to vector<5x64xf32>
    %131 = arith.mulf %129, %130 : vector<5x64xf32>
    %132 = vector.broadcast %111 : vector<1x64xf32> to vector<5x64xf32>
    %133 = arith.addf %131, %132 : vector<5x64xf32>
    %134 = arith.truncf %133 : vector<5x64xf32> to vector<5x64xbf16>
    %135 = arith.index_cast %c0_i32 : i32 to index
    %c0_44 = arith.constant 0 : index
    %c0_45 = arith.constant 0 : index
    %136 = vector.load %arg12[%135, %c0_44, %c0_45] : memref<2x64x128xbf16, #tpu.memory_space<vmem>>, vector<1x64x128xbf16>
    %137 = vector.shape_cast %136 : vector<1x64x128xbf16> to vector<64x128xbf16>
    %cst_46 = arith.constant dense<0.000000e+00> : vector<5x128xf32>
    %138 = tpu.matmul %134, %137, %cst_46 {dimension_numbers = #tpu.dot_dimension_numbers<[1], [0], [0], [1], [0, 0, 1, 1], [], []>} : vector<5x64xbf16>, vector<64x128xbf16>, vector<5x128xf32> -> vector<5x128xf32>
    %139 = arith.index_cast %c0_i32 : i32 to index
    %c0_47 = arith.constant 0 : index
    %c0_48 = arith.constant 0 : index
    %140 = vector.load %arg13[%139, %c0_47, %c0_48] : memref<2x1x128xf32, #tpu.memory_space<vmem>>, vector<1x1x128xf32>
    %141 = vector.shape_cast %140 : vector<1x1x128xf32> to vector<1x128xf32>
    %142 = vector.broadcast %141 : vector<1x128xf32> to vector<5x128xf32>
    %143 = arith.addf %138, %142 : vector<5x128xf32>
    %cst_49 = arith.constant 5.000000e-01 : f32
    %144 = vector.broadcast %cst_49 : f32 to vector<5x128xf32>
    %145 = arith.mulf %144, %143 : vector<5x128xf32>
    %cst_50 = arith.constant 0.707106769 : f32
    %146 = vector.broadcast %cst_50 : f32 to vector<5x128xf32>
    %147 = arith.mulf %143, %146 : vector<5x128xf32>
    %148 = math.absf %147 : vector<5x128xf32>
    %cst_51 = arith.constant 0.327591091 : f32
    %149 = vector.broadcast %cst_51 : f32 to vector<5x128xf32>
    %150 = arith.mulf %149, %148 : vector<5x128xf32>
    %cst_52 = arith.constant 1.000000e+00 : f32
    %151 = vector.broadcast %cst_52 : f32 to vector<5x128xf32>
    %152 = arith.addf %151, %150 : vector<5x128xf32>
    %153 = tpu.reciprocal %152 {approx = true} : vector<5x128xf32> -> vector<5x128xf32>
    %cst_53 = arith.constant 1.06140542 : f32
    %154 = vector.broadcast %cst_53 : f32 to vector<5x128xf32>
    %155 = arith.mulf %154, %153 : vector<5x128xf32>
    %cst_54 = arith.constant -1.45315206 : f32
    %156 = vector.broadcast %cst_54 : f32 to vector<5x128xf32>
    %157 = arith.addf %155, %156 : vector<5x128xf32>
    %158 = arith.mulf %157, %153 : vector<5x128xf32>
    %cst_55 = arith.constant 1.42141378 : f32
    %159 = vector.broadcast %cst_55 : f32 to vector<5x128xf32>
    %160 = arith.addf %158, %159 : vector<5x128xf32>
    %161 = arith.mulf %160, %153 : vector<5x128xf32>
    %cst_56 = arith.constant -0.284496725 : f32
    %162 = vector.broadcast %cst_56 : f32 to vector<5x128xf32>
    %163 = arith.addf %161, %162 : vector<5x128xf32>
    %164 = arith.mulf %163, %153 : vector<5x128xf32>
    %cst_57 = arith.constant 0.254829586 : f32
    %165 = vector.broadcast %cst_57 : f32 to vector<5x128xf32>
    %166 = arith.addf %164, %165 : vector<5x128xf32>
    %167 = arith.mulf %166, %153 : vector<5x128xf32>
    %cst_58 = arith.constant 0.000000e+00 : f32
    %168 = vector.broadcast %cst_58 : f32 to vector<5x128xf32>
    %169 = arith.subf %168, %148 : vector<5x128xf32>
    %170 = arith.mulf %169, %148 : vector<5x128xf32>
    %171 = math.exp %170 : vector<5x128xf32>
    %172 = arith.mulf %167, %171 : vector<5x128xf32>
    %cst_59 = arith.constant 1.000000e+00 : f32
    %173 = vector.broadcast %cst_59 : f32 to vector<5x128xf32>
    %174 = arith.subf %173, %172 : vector<5x128xf32>
    %cst_60 = arith.constant 0.000000e+00 : f32
    %175 = vector.broadcast %cst_60 : f32 to vector<5x128xf32>
    %176 = arith.cmpf oge, %147, %175 : vector<5x128xf32>
    %cst_61 = arith.constant 0.000000e+00 : f32
    %177 = vector.broadcast %cst_61 : f32 to vector<5x128xf32>
    %178 = arith.subf %177, %174 : vector<5x128xf32>
    %179 = arith.select %176, %174, %178 : vector<5x128xi1>, vector<5x128xf32>
    %cst_62 = arith.constant 1.000000e+00 : f32
    %180 = vector.broadcast %cst_62 : f32 to vector<5x128xf32>
    %181 = arith.addf %180, %179 : vector<5x128xf32>
    %182 = arith.mulf %145, %181 : vector<5x128xf32>
    %183 = arith.truncf %182 : vector<5x128xf32> to vector<5x128xbf16>
    %184 = arith.index_cast %c0_i32 : i32 to index
    %c0_63 = arith.constant 0 : index
    %c0_64 = arith.constant 0 : index
    %185 = vector.load %arg14[%184, %c0_63, %c0_64] : memref<2x128x64xbf16, #tpu.memory_space<vmem>>, vector<1x128x64xbf16>
    %186 = vector.shape_cast %185 : vector<1x128x64xbf16> to vector<128x64xbf16>
    %cst_65 = arith.constant dense<0.000000e+00> : vector<5x64xf32>
    %187 = tpu.matmul %183, %186, %cst_65 {dimension_numbers = #tpu.dot_dimension_numbers<[1], [0], [0], [1], [0, 0, 1, 1], [], []>} : vector<5x128xbf16>, vector<128x64xbf16>, vector<5x64xf32> -> vector<5x64xf32>
    %188 = arith.index_cast %c0_i32 : i32 to index
    %c0_66 = arith.constant 0 : index
    %c0_67 = arith.constant 0 : index
    %189 = vector.load %arg15[%188, %c0_66, %c0_67] : memref<2x1x64xf32, #tpu.memory_space<vmem>>, vector<1x1x64xf32>
    %190 = vector.shape_cast %189 : vector<1x1x64xf32> to vector<1x64xf32>
    %191 = vector.broadcast %190 : vector<1x64xf32> to vector<5x64xf32>
    %192 = arith.addf %187, %191 : vector<5x64xf32>
    %193 = arith.addf %105, %192 : vector<5x64xf32>
    %c1_i32 = arith.constant 1 : i32
    %194 = arith.index_cast %c1_i32 : i32 to index
    %c0_68 = arith.constant 0 : index
    %c0_69 = arith.constant 0 : index
    %195 = vector.load %arg4[%194, %c0_68, %c0_69] : memref<2x1x64xf32, #tpu.memory_space<vmem>>, vector<1x1x64xf32>
    %196 = vector.shape_cast %195 : vector<1x1x64xf32> to vector<1x64xf32>
    %197 = arith.index_cast %c1_i32 : i32 to index
    %c0_70 = arith.constant 0 : index
    %c0_71 = arith.constant 0 : index
    %198 = vector.load %arg5[%197, %c0_70, %c0_71] : memref<2x1x64xf32, #tpu.memory_space<vmem>>, vector<1x1x64xf32>
    %199 = vector.shape_cast %198 : vector<1x1x64xf32> to vector<1x64xf32>
    %cst_72 = arith.constant dense<0.000000e+00> : vector<5xf32>
    %200 = vector.multi_reduction <add>, %193, %cst_72 [1] : vector<5x64xf32> to vector<5xf32>
    %201 = vector.shape_cast %200 : vector<5xf32> to vector<5x1xf32>
    %cst_73 = arith.constant 6.400000e+01 : f32
    %202 = vector.broadcast %cst_73 : f32 to vector<5x1xf32>
    %203 = arith.divf %201, %202 : vector<5x1xf32>
    %204 = vector.broadcast %203 : vector<5x1xf32> to vector<5x64xf32>
    %205 = arith.subf %193, %204 : vector<5x64xf32>
    %206 = arith.mulf %205, %205 : vector<5x64xf32>
    %cst_74 = arith.constant dense<0.000000e+00> : vector<5xf32>
    %207 = vector.multi_reduction <add>, %206, %cst_74 [1] : vector<5x64xf32> to vector<5xf32>
    %208 = vector.shape_cast %207 : vector<5xf32> to vector<5x1xf32>
    %cst_75 = arith.constant 6.400000e+01 : f32
    %209 = vector.broadcast %cst_75 : f32 to vector<5x1xf32>
    %210 = arith.divf %208, %209 : vector<5x1xf32>
    %211 = vector.broadcast %203 : vector<5x1xf32> to vector<5x64xf32>
    %212 = arith.subf %193, %211 : vector<5x64xf32>
    %cst_76 = arith.constant 9.99999997E-7 : f32
    %213 = vector.broadcast %cst_76 : f32 to vector<5x1xf32>
    %214 = arith.addf %210, %213 : vector<5x1xf32>
    %215 = math.rsqrt %214 : vector<5x1xf32>
    %216 = vector.broadcast %215 : vector<5x1xf32> to vector<5x64xf32>
    %217 = arith.mulf %212, %216 : vector<5x64xf32>
    %218 = vector.broadcast %196 : vector<1x64xf32> to vector<5x64xf32>
    %219 = arith.mulf %217, %218 : vector<5x64xf32>
    %220 = vector.broadcast %199 : vector<1x64xf32> to vector<5x64xf32>
    %221 = arith.addf %219, %220 : vector<5x64xf32>
    %222 = arith.truncf %221 : vector<5x64xf32> to vector<5x64xbf16>
    %223 = arith.index_cast %c1_i32 : i32 to index
    %c0_77 = arith.constant 0 : index
    %c0_78 = arith.constant 0 : index
    %224 = vector.load %arg6[%223, %c0_77, %c0_78] : memref<2x64x192xbf16, #tpu.memory_space<vmem>>, vector<1x64x192xbf16>
    %225 = vector.shape_cast %224 : vector<1x64x192xbf16> to vector<64x192xbf16>
    %cst_79 = arith.constant dense<0.000000e+00> : vector<5x192xf32>
    %226 = tpu.matmul %222, %225, %cst_79 {dimension_numbers = #tpu.dot_dimension_numbers<[1], [0], [0], [1], [0, 0, 1, 1], [], []>} : vector<5x64xbf16>, vector<64x192xbf16>, vector<5x192xf32> -> vector<5x192xf32>
    %227 = arith.index_cast %c1_i32 : i32 to index
    %c0_80 = arith.constant 0 : index
    %c0_81 = arith.constant 0 : index
    %228 = vector.load %arg7[%227, %c0_80, %c0_81] : memref<2x1x192xf32, #tpu.memory_space<vmem>>, vector<1x1x192xf32>
    %229 = vector.shape_cast %228 : vector<1x1x192xf32> to vector<1x192xf32>
    %230 = vector.broadcast %229 : vector<1x192xf32> to vector<5x192xf32>
    %231 = arith.addf %226, %230 : vector<5x192xf32>
    %232 = vector.extract_strided_slice %231 {offsets = [0, 0], sizes = [5, 64], strides = [1, 1]} : vector<5x192xf32> to vector<5x64xf32>
    %233 = arith.truncf %232 : vector<5x64xf32> to vector<5x64xbf16>
    %234 = vector.extract_strided_slice %231 {offsets = [0, 64], sizes = [5, 64], strides = [1, 1]} : vector<5x192xf32> to vector<5x64xf32>
    %235 = arith.truncf %234 : vector<5x64xf32> to vector<5x64xbf16>
    %236 = vector.extract_strided_slice %231 {offsets = [0, 128], sizes = [5, 64], strides = [1, 1]} : vector<5x192xf32> to vector<5x64xf32>
    %237 = arith.truncf %236 : vector<5x64xf32> to vector<5x64xbf16>
    %238 = vector.extract_strided_slice %233 {offsets = [0, 0], sizes = [5, 16], strides = [1, 1]} : vector<5x64xbf16> to vector<5x16xbf16>
    %239 = vector.extract_strided_slice %235 {offsets = [0, 0], sizes = [5, 16], strides = [1, 1]} : vector<5x64xbf16> to vector<5x16xbf16>
    %cst_82 = arith.constant dense<0.000000e+00> : vector<5x5xf32>
    %240 = tpu.matmul %238, %239, %cst_82 {dimension_numbers = #tpu.dot_dimension_numbers<[1], [1], [0], [0], [0, 0, 1, 0], [], []>} : vector<5x16xbf16>, vector<5x16xbf16>, vector<5x5xf32> -> vector<5x5xf32>
    %241 = vector.extract_strided_slice %233 {offsets = [0, 16], sizes = [5, 16], strides = [1, 1]} : vector<5x64xbf16> to vector<5x16xbf16>
    %242 = vector.extract_strided_slice %235 {offsets = [0, 16], sizes = [5, 16], strides = [1, 1]} : vector<5x64xbf16> to vector<5x16xbf16>
    %cst_83 = arith.constant dense<0.000000e+00> : vector<5x5xf32>
    %243 = tpu.matmul %241, %242, %cst_83 {dimension_numbers = #tpu.dot_dimension_numbers<[1], [1], [0], [0], [0, 0, 1, 0], [], []>} : vector<5x16xbf16>, vector<5x16xbf16>, vector<5x5xf32> -> vector<5x5xf32>
    %244 = vector.extract_strided_slice %233 {offsets = [0, 32], sizes = [5, 16], strides = [1, 1]} : vector<5x64xbf16> to vector<5x16xbf16>
    %245 = vector.extract_strided_slice %235 {offsets = [0, 32], sizes = [5, 16], strides = [1, 1]} : vector<5x64xbf16> to vector<5x16xbf16>
    %cst_84 = arith.constant dense<0.000000e+00> : vector<5x5xf32>
    %246 = tpu.matmul %244, %245, %cst_84 {dimension_numbers = #tpu.dot_dimension_numbers<[1], [1], [0], [0], [0, 0, 1, 0], [], []>} : vector<5x16xbf16>, vector<5x16xbf16>, vector<5x5xf32> -> vector<5x5xf32>
    %247 = vector.extract_strided_slice %233 {offsets = [0, 48], sizes = [5, 16], strides = [1, 1]} : vector<5x64xbf16> to vector<5x16xbf16>
    %248 = vector.extract_strided_slice %235 {offsets = [0, 48], sizes = [5, 16], strides = [1, 1]} : vector<5x64xbf16> to vector<5x16xbf16>
    %cst_85 = arith.constant dense<0.000000e+00> : vector<5x5xf32>
    %249 = tpu.matmul %247, %248, %cst_85 {dimension_numbers = #tpu.dot_dimension_numbers<[1], [1], [0], [0], [0, 0, 1, 0], [], []>} : vector<5x16xbf16>, vector<5x16xbf16>, vector<5x5xf32> -> vector<5x5xf32>
    %250 = vector.shape_cast %240 : vector<5x5xf32> to vector<1x5x5xf32>
    %251 = vector.shape_cast %243 : vector<5x5xf32> to vector<1x5x5xf32>
    %252 = vector.shape_cast %246 : vector<5x5xf32> to vector<1x5x5xf32>
    %253 = vector.shape_cast %249 : vector<5x5xf32> to vector<1x5x5xf32>
    %254 = tpu.concatenate %250, %251, %252, %253 in 0 : vector<1x5x5xf32>, vector<1x5x5xf32>, vector<1x5x5xf32>, vector<1x5x5xf32> -> vector<4x5x5xf32>
    %cst_86 = arith.constant dense<0xFF800000> : vector<4x5xf32>
    %255 = vector.multi_reduction <maximumf>, %254, %cst_86 [2] : vector<4x5x5xf32> to vector<4x5xf32>
    %256 = vector.shape_cast %255 : vector<4x5xf32> to vector<4x5x1xf32>
    %257 = vector.broadcast %256 : vector<4x5x1xf32> to vector<4x5x5xf32>
    %258 = arith.subf %254, %257 : vector<4x5x5xf32>
    %259 = math.exp %258 : vector<4x5x5xf32>
    %cst_87 = arith.constant dense<0.000000e+00> : vector<4x5xf32>
    %260 = vector.multi_reduction <add>, %259, %cst_87 [2] : vector<4x5x5xf32> to vector<4x5xf32>
    %261 = vector.shape_cast %260 : vector<4x5xf32> to vector<4x5x1xf32>
    %262 = tpu.reciprocal %261 {approx = true} : vector<4x5x1xf32> -> vector<4x5x1xf32>
    %263 = vector.broadcast %262 : vector<4x5x1xf32> to vector<4x5x5xf32>
    %264 = arith.mulf %259, %263 : vector<4x5x5xf32>
    %265 = arith.truncf %264 : vector<4x5x5xf32> to vector<4x5x5xbf16>
    %266 = vector.extract_strided_slice %265 {offsets = [0, 0, 0], sizes = [1, 5, 5], strides = [1, 1, 1]} : vector<4x5x5xbf16> to vector<1x5x5xbf16>
    %267 = vector.shape_cast %266 : vector<1x5x5xbf16> to vector<5x5xbf16>
    %268 = vector.extract_strided_slice %237 {offsets = [0, 0], sizes = [5, 16], strides = [1, 1]} : vector<5x64xbf16> to vector<5x16xbf16>
    %cst_88 = arith.constant dense<0.000000e+00> : vector<5x16xf32>
    %269 = tpu.matmul %267, %268, %cst_88 {dimension_numbers = #tpu.dot_dimension_numbers<[1], [0], [0], [1], [0, 0, 1, 1], [], []>} : vector<5x5xbf16>, vector<5x16xbf16>, vector<5x16xf32> -> vector<5x16xf32>
    %270 = vector.extract_strided_slice %265 {offsets = [1, 0, 0], sizes = [1, 5, 5], strides = [1, 1, 1]} : vector<4x5x5xbf16> to vector<1x5x5xbf16>
    %271 = vector.shape_cast %270 : vector<1x5x5xbf16> to vector<5x5xbf16>
    %272 = vector.extract_strided_slice %237 {offsets = [0, 16], sizes = [5, 16], strides = [1, 1]} : vector<5x64xbf16> to vector<5x16xbf16>
    %cst_89 = arith.constant dense<0.000000e+00> : vector<5x16xf32>
    %273 = tpu.matmul %271, %272, %cst_89 {dimension_numbers = #tpu.dot_dimension_numbers<[1], [0], [0], [1], [0, 0, 1, 1], [], []>} : vector<5x5xbf16>, vector<5x16xbf16>, vector<5x16xf32> -> vector<5x16xf32>
    %274 = vector.extract_strided_slice %265 {offsets = [2, 0, 0], sizes = [1, 5, 5], strides = [1, 1, 1]} : vector<4x5x5xbf16> to vector<1x5x5xbf16>
    %275 = vector.shape_cast %274 : vector<1x5x5xbf16> to vector<5x5xbf16>
    %276 = vector.extract_strided_slice %237 {offsets = [0, 32], sizes = [5, 16], strides = [1, 1]} : vector<5x64xbf16> to vector<5x16xbf16>
    %cst_90 = arith.constant dense<0.000000e+00> : vector<5x16xf32>
    %277 = tpu.matmul %275, %276, %cst_90 {dimension_numbers = #tpu.dot_dimension_numbers<[1], [0], [0], [1], [0, 0, 1, 1], [], []>} : vector<5x5xbf16>, vector<5x16xbf16>, vector<5x16xf32> -> vector<5x16xf32>
    %278 = vector.extract_strided_slice %265 {offsets = [3, 0, 0], sizes = [1, 5, 5], strides = [1, 1, 1]} : vector<4x5x5xbf16> to vector<1x5x5xbf16>
    %279 = vector.shape_cast %278 : vector<1x5x5xbf16> to vector<5x5xbf16>
    %280 = vector.extract_strided_slice %237 {offsets = [0, 48], sizes = [5, 16], strides = [1, 1]} : vector<5x64xbf16> to vector<5x16xbf16>
    %cst_91 = arith.constant dense<0.000000e+00> : vector<5x16xf32>
    %281 = tpu.matmul %279, %280, %cst_91 {dimension_numbers = #tpu.dot_dimension_numbers<[1], [0], [0], [1], [0, 0, 1, 1], [], []>} : vector<5x5xbf16>, vector<5x16xbf16>, vector<5x16xf32> -> vector<5x16xf32>
    %282 = tpu.concatenate %269, %273, %277, %281 in 1 : vector<5x16xf32>, vector<5x16xf32>, vector<5x16xf32>, vector<5x16xf32> -> vector<5x64xf32>
    %283 = arith.truncf %282 : vector<5x64xf32> to vector<5x64xbf16>
    %284 = arith.index_cast %c1_i32 : i32 to index
    %c0_92 = arith.constant 0 : index
    %c0_93 = arith.constant 0 : index
    %285 = vector.load %arg8[%284, %c0_92, %c0_93] : memref<2x64x64xbf16, #tpu.memory_space<vmem>>, vector<1x64x64xbf16>
    %286 = vector.shape_cast %285 : vector<1x64x64xbf16> to vector<64x64xbf16>
    %cst_94 = arith.constant dense<0.000000e+00> : vector<5x64xf32>
    %287 = tpu.matmul %283, %286, %cst_94 {dimension_numbers = #tpu.dot_dimension_numbers<[1], [0], [0], [1], [0, 0, 1, 1], [], []>} : vector<5x64xbf16>, vector<64x64xbf16>, vector<5x64xf32> -> vector<5x64xf32>
    %288 = arith.index_cast %c1_i32 : i32 to index
    %c0_95 = arith.constant 0 : index
    %c0_96 = arith.constant 0 : index
    %289 = vector.load %arg9[%288, %c0_95, %c0_96] : memref<2x1x64xf32, #tpu.memory_space<vmem>>, vector<1x1x64xf32>
    %290 = vector.shape_cast %289 : vector<1x1x64xf32> to vector<1x64xf32>
    %291 = vector.broadcast %290 : vector<1x64xf32> to vector<5x64xf32>
    %292 = arith.addf %287, %291 : vector<5x64xf32>
    %293 = arith.addf %193, %292 : vector<5x64xf32>
    %294 = arith.index_cast %c1_i32 : i32 to index
    %c0_97 = arith.constant 0 : index
    %c0_98 = arith.constant 0 : index
    %295 = vector.load %arg10[%294, %c0_97, %c0_98] : memref<2x1x64xf32, #tpu.memory_space<vmem>>, vector<1x1x64xf32>
    %296 = vector.shape_cast %295 : vector<1x1x64xf32> to vector<1x64xf32>
    %297 = arith.index_cast %c1_i32 : i32 to index
    %c0_99 = arith.constant 0 : index
    %c0_100 = arith.constant 0 : index
    %298 = vector.load %arg11[%297, %c0_99, %c0_100] : memref<2x1x64xf32, #tpu.memory_space<vmem>>, vector<1x1x64xf32>
    %299 = vector.shape_cast %298 : vector<1x1x64xf32> to vector<1x64xf32>
    %cst_101 = arith.constant dense<0.000000e+00> : vector<5xf32>
    %300 = vector.multi_reduction <add>, %293, %cst_101 [1] : vector<5x64xf32> to vector<5xf32>
    %301 = vector.shape_cast %300 : vector<5xf32> to vector<5x1xf32>
    %cst_102 = arith.constant 6.400000e+01 : f32
    %302 = vector.broadcast %cst_102 : f32 to vector<5x1xf32>
    %303 = arith.divf %301, %302 : vector<5x1xf32>
    %304 = vector.broadcast %303 : vector<5x1xf32> to vector<5x64xf32>
    %305 = arith.subf %293, %304 : vector<5x64xf32>
    %306 = arith.mulf %305, %305 : vector<5x64xf32>
    %cst_103 = arith.constant dense<0.000000e+00> : vector<5xf32>
    %307 = vector.multi_reduction <add>, %306, %cst_103 [1] : vector<5x64xf32> to vector<5xf32>
    %308 = vector.shape_cast %307 : vector<5xf32> to vector<5x1xf32>
    %cst_104 = arith.constant 6.400000e+01 : f32
    %309 = vector.broadcast %cst_104 : f32 to vector<5x1xf32>
    %310 = arith.divf %308, %309 : vector<5x1xf32>
    %311 = vector.broadcast %303 : vector<5x1xf32> to vector<5x64xf32>
    %312 = arith.subf %293, %311 : vector<5x64xf32>
    %cst_105 = arith.constant 9.99999997E-7 : f32
    %313 = vector.broadcast %cst_105 : f32 to vector<5x1xf32>
    %314 = arith.addf %310, %313 : vector<5x1xf32>
    %315 = math.rsqrt %314 : vector<5x1xf32>
    %316 = vector.broadcast %315 : vector<5x1xf32> to vector<5x64xf32>
    %317 = arith.mulf %312, %316 : vector<5x64xf32>
    %318 = vector.broadcast %296 : vector<1x64xf32> to vector<5x64xf32>
    %319 = arith.mulf %317, %318 : vector<5x64xf32>
    %320 = vector.broadcast %299 : vector<1x64xf32> to vector<5x64xf32>
    %321 = arith.addf %319, %320 : vector<5x64xf32>
    %322 = arith.truncf %321 : vector<5x64xf32> to vector<5x64xbf16>
    %323 = arith.index_cast %c1_i32 : i32 to index
    %c0_106 = arith.constant 0 : index
    %c0_107 = arith.constant 0 : index
    %324 = vector.load %arg12[%323, %c0_106, %c0_107] : memref<2x64x128xbf16, #tpu.memory_space<vmem>>, vector<1x64x128xbf16>
    %325 = vector.shape_cast %324 : vector<1x64x128xbf16> to vector<64x128xbf16>
    %cst_108 = arith.constant dense<0.000000e+00> : vector<5x128xf32>
    %326 = tpu.matmul %322, %325, %cst_108 {dimension_numbers = #tpu.dot_dimension_numbers<[1], [0], [0], [1], [0, 0, 1, 1], [], []>} : vector<5x64xbf16>, vector<64x128xbf16>, vector<5x128xf32> -> vector<5x128xf32>
    %327 = arith.index_cast %c1_i32 : i32 to index
    %c0_109 = arith.constant 0 : index
    %c0_110 = arith.constant 0 : index
    %328 = vector.load %arg13[%327, %c0_109, %c0_110] : memref<2x1x128xf32, #tpu.memory_space<vmem>>, vector<1x1x128xf32>
    %329 = vector.shape_cast %328 : vector<1x1x128xf32> to vector<1x128xf32>
    %330 = vector.broadcast %329 : vector<1x128xf32> to vector<5x128xf32>
    %331 = arith.addf %326, %330 : vector<5x128xf32>
    %cst_111 = arith.constant 5.000000e-01 : f32
    %332 = vector.broadcast %cst_111 : f32 to vector<5x128xf32>
    %333 = arith.mulf %332, %331 : vector<5x128xf32>
    %cst_112 = arith.constant 0.707106769 : f32
    %334 = vector.broadcast %cst_112 : f32 to vector<5x128xf32>
    %335 = arith.mulf %331, %334 : vector<5x128xf32>
    %336 = math.absf %335 : vector<5x128xf32>
    %cst_113 = arith.constant 0.327591091 : f32
    %337 = vector.broadcast %cst_113 : f32 to vector<5x128xf32>
    %338 = arith.mulf %337, %336 : vector<5x128xf32>
    %cst_114 = arith.constant 1.000000e+00 : f32
    %339 = vector.broadcast %cst_114 : f32 to vector<5x128xf32>
    %340 = arith.addf %339, %338 : vector<5x128xf32>
    %341 = tpu.reciprocal %340 {approx = true} : vector<5x128xf32> -> vector<5x128xf32>
    %cst_115 = arith.constant 1.06140542 : f32
    %342 = vector.broadcast %cst_115 : f32 to vector<5x128xf32>
    %343 = arith.mulf %342, %341 : vector<5x128xf32>
    %cst_116 = arith.constant -1.45315206 : f32
    %344 = vector.broadcast %cst_116 : f32 to vector<5x128xf32>
    %345 = arith.addf %343, %344 : vector<5x128xf32>
    %346 = arith.mulf %345, %341 : vector<5x128xf32>
    %cst_117 = arith.constant 1.42141378 : f32
    %347 = vector.broadcast %cst_117 : f32 to vector<5x128xf32>
    %348 = arith.addf %346, %347 : vector<5x128xf32>
    %349 = arith.mulf %348, %341 : vector<5x128xf32>
    %cst_118 = arith.constant -0.284496725 : f32
    %350 = vector.broadcast %cst_118 : f32 to vector<5x128xf32>
    %351 = arith.addf %349, %350 : vector<5x128xf32>
    %352 = arith.mulf %351, %341 : vector<5x128xf32>
    %cst_119 = arith.constant 0.254829586 : f32
    %353 = vector.broadcast %cst_119 : f32 to vector<5x128xf32>
    %354 = arith.addf %352, %353 : vector<5x128xf32>
    %355 = arith.mulf %354, %341 : vector<5x128xf32>
    %cst_120 = arith.constant 0.000000e+00 : f32
    %356 = vector.broadcast %cst_120 : f32 to vector<5x128xf32>
    %357 = arith.subf %356, %336 : vector<5x128xf32>
    %358 = arith.mulf %357, %336 : vector<5x128xf32>
    %359 = math.exp %358 : vector<5x128xf32>
    %360 = arith.mulf %355, %359 : vector<5x128xf32>
    %cst_121 = arith.constant 1.000000e+00 : f32
    %361 = vector.broadcast %cst_121 : f32 to vector<5x128xf32>
    %362 = arith.subf %361, %360 : vector<5x128xf32>
    %cst_122 = arith.constant 0.000000e+00 : f32
    %363 = vector.broadcast %cst_122 : f32 to vector<5x128xf32>
    %364 = arith.cmpf oge, %335, %363 : vector<5x128xf32>
    %cst_123 = arith.constant 0.000000e+00 : f32
    %365 = vector.broadcast %cst_123 : f32 to vector<5x128xf32>
    %366 = arith.subf %365, %362 : vector<5x128xf32>
    %367 = arith.select %364, %362, %366 : vector<5x128xi1>, vector<5x128xf32>
    %cst_124 = arith.constant 1.000000e+00 : f32
    %368 = vector.broadcast %cst_124 : f32 to vector<5x128xf32>
    %369 = arith.addf %368, %367 : vector<5x128xf32>
    %370 = arith.mulf %333, %369 : vector<5x128xf32>
    %371 = arith.truncf %370 : vector<5x128xf32> to vector<5x128xbf16>
    %372 = arith.index_cast %c1_i32 : i32 to index
    %c0_125 = arith.constant 0 : index
    %c0_126 = arith.constant 0 : index
    %373 = vector.load %arg14[%372, %c0_125, %c0_126] : memref<2x128x64xbf16, #tpu.memory_space<vmem>>, vector<1x128x64xbf16>
    %374 = vector.shape_cast %373 : vector<1x128x64xbf16> to vector<128x64xbf16>
    %cst_127 = arith.constant dense<0.000000e+00> : vector<5x64xf32>
    %375 = tpu.matmul %371, %374, %cst_127 {dimension_numbers = #tpu.dot_dimension_numbers<[1], [0], [0], [1], [0, 0, 1, 1], [], []>} : vector<5x128xbf16>, vector<128x64xbf16>, vector<5x64xf32> -> vector<5x64xf32>
    %376 = arith.index_cast %c1_i32 : i32 to index
    %c0_128 = arith.constant 0 : index
    %c0_129 = arith.constant 0 : index
    %377 = vector.load %arg15[%376, %c0_128, %c0_129] : memref<2x1x64xf32, #tpu.memory_space<vmem>>, vector<1x1x64xf32>
    %378 = vector.shape_cast %377 : vector<1x1x64xf32> to vector<1x64xf32>
    %379 = vector.broadcast %378 : vector<1x64xf32> to vector<5x64xf32>
    %380 = arith.addf %375, %379 : vector<5x64xf32>
    %381 = arith.addf %293, %380 : vector<5x64xf32>
    %c2_i32 = arith.constant 2 : i32
    %382 = vector.extract_strided_slice %381 {offsets = [0, 0], sizes = [1, 64], strides = [1, 1]} : vector<5x64xf32> to vector<1x64xf32>
    %c0_130 = arith.constant 0 : index
    %c0_131 = arith.constant 0 : index
    %383 = vector.load %arg16[%c0_130, %c0_131] : memref<1x64xf32, #tpu.memory_space<vmem>>, vector<1x64xf32>
    %c0_132 = arith.constant 0 : index
    %c0_133 = arith.constant 0 : index
    %384 = vector.load %arg17[%c0_132, %c0_133] : memref<1x64xf32, #tpu.memory_space<vmem>>, vector<1x64xf32>
    %cst_134 = arith.constant dense<0.000000e+00> : vector<1xf32>
    %385 = vector.multi_reduction <add>, %382, %cst_134 [1] : vector<1x64xf32> to vector<1xf32>
    %386 = vector.shape_cast %385 : vector<1xf32> to vector<1x1xf32>
    %cst_135 = arith.constant 6.400000e+01 : f32
    %387 = vector.broadcast %cst_135 : f32 to vector<1x1xf32>
    %388 = arith.divf %386, %387 : vector<1x1xf32>
    %389 = vector.broadcast %388 : vector<1x1xf32> to vector<1x64xf32>
    %390 = arith.subf %382, %389 : vector<1x64xf32>
    %391 = arith.mulf %390, %390 : vector<1x64xf32>
    %cst_136 = arith.constant dense<0.000000e+00> : vector<1xf32>
    %392 = vector.multi_reduction <add>, %391, %cst_136 [1] : vector<1x64xf32> to vector<1xf32>
    %393 = vector.shape_cast %392 : vector<1xf32> to vector<1x1xf32>
    %cst_137 = arith.constant 6.400000e+01 : f32
    %394 = vector.broadcast %cst_137 : f32 to vector<1x1xf32>
    %395 = arith.divf %393, %394 : vector<1x1xf32>
    %396 = vector.broadcast %388 : vector<1x1xf32> to vector<1x64xf32>
    %397 = arith.subf %382, %396 : vector<1x64xf32>
    %cst_138 = arith.constant 9.99999997E-7 : f32
    %398 = vector.broadcast %cst_138 : f32 to vector<1x1xf32>
    %399 = arith.addf %395, %398 : vector<1x1xf32>
    %400 = math.rsqrt %399 : vector<1x1xf32>
    %401 = vector.broadcast %400 : vector<1x1xf32> to vector<1x64xf32>
    %402 = arith.mulf %397, %401 : vector<1x64xf32>
    %403 = arith.mulf %402, %383 : vector<1x64xf32>
    %404 = arith.addf %403, %384 : vector<1x64xf32>
    %c0_139 = arith.constant 0 : index
    %c0_140 = arith.constant 0 : index
    %c0_141 = arith.constant 0 : index
    %405 = vector.load %arg18[%c0_139, %c0_140, %c0_141] : memref<1x1x64xf32, #tpu.memory_space<vmem>>, vector<1x1x64xf32>
    %406 = vector.shape_cast %405 : vector<1x1x64xf32> to vector<1x64xf32>
    %407 = vector.shape_cast %404 : vector<1x64xf32> to vector<1x1x64xf32>
    tpu.vector_store %arg18[%c0_139, %c0_140, %c0_141], %407 {strides = array<i32>} : memref<1x1x64xf32, #tpu.memory_space<vmem>>, vector<1x1x64xf32>,
    return
  }
  func.func @transform_0(%arg0: i32) -> (i32, i32, i32) {
    %c0_i32 = arith.constant 0 : i32
    %c0_i32_0 = arith.constant 0 : i32
    %c0_i32_1 = arith.constant 0 : i32
    return %arg0, %c0_i32, %c0_i32_0 : i32, i32, i32
  }
  func.func @transform_1(%arg0: i32) -> (i32, i32) {
    %c0_i32 = arith.constant 0 : i32
    %c0_i32_0 = arith.constant 0 : i32
    %c0_i32_1 = arith.constant 0 : i32
    return %c0_i32, %c0_i32_0 : i32, i32
  }
  func.func @transform_2(%arg0: i32) -> (i32, i32) {
    %c0_i32 = arith.constant 0 : i32
    %c0_i32_0 = arith.constant 0 : i32
    %c0_i32_1 = arith.constant 0 : i32
    return %c0_i32, %c0_i32_0 : i32, i32
  }
  func.func @transform_3(%arg0: i32) -> (i32, i32, i32) {
    %c0_i32 = arith.constant 0 : i32
    %c0_i32_0 = arith.constant 0 : i32
    %c0_i32_1 = arith.constant 0 : i32
    %c0_i32_2 = arith.constant 0 : i32
    return %c0_i32, %c0_i32_0, %c0_i32_1 : i32, i32, i32
  }
  func.func @transform_4(%arg0: i32) -> (i32, i32, i32) {
    %c0_i32 = arith.constant 0 : i32
    %c0_i32_0 = arith.constant 0 : i32
    %c0_i32_1 = arith.constant 0 : i32
    %c0_i32_2 = arith.constant 0 : i32
    return %c0_i32, %c0_i32_0, %c0_i32_1 : i32, i32, i32
  }
  func.func @transform_5(%arg0: i32) -> (i32, i32, i32) {
    %c0_i32 = arith.constant 0 : i32
    %c0_i32_0 = arith.constant 0 : i32
    %c0_i32_1 = arith.constant 0 : i32
    %c0_i32_2 = arith.constant 0 : i32
    return %c0_i32, %c0_i32_0, %c0_i32_1 : i32, i32, i32
  }
  func.func @transform_6(%arg0: i32) -> (i32, i32, i32) {
    %c0_i32 = arith.constant 0 : i32
    %c0_i32_0 = arith.constant 0 : i32
    %c0_i32_1 = arith.constant 0 : i32
    %c0_i32_2 = arith.constant 0 : i32
    return %c0_i32, %c0_i32_0, %c0_i32_1 : i32, i32, i32
  }
  func.func @transform_7(%arg0: i32) -> (i32, i32, i32) {
    %c0_i32 = arith.constant 0 : i32
    %c0_i32_0 = arith.constant 0 : i32
    %c0_i32_1 = arith.constant 0 : i32
    %c0_i32_2 = arith.constant 0 : i32
    return %c0_i32, %c0_i32_0, %c0_i32_1 : i32, i32, i32
  }
  func.func @transform_8(%arg0: i32) -> (i32, i32, i32) {
    %c0_i32 = arith.constant 0 : i32
    %c0_i32_0 = arith.constant 0 : i32
    %c0_i32_1 = arith.constant 0 : i32
    %c0_i32_2 = arith.constant 0 : i32
    return %c0_i32, %c0_i32_0, %c0_i32_1 : i32, i32, i32
  }
  func.func @transform_9(%arg0: i32) -> (i32, i32, i32) {
    %c0_i32 = arith.constant 0 : i32
    %c0_i32_0 = arith.constant 0 : i32
    %c0_i32_1 = arith.constant 0 : i32
    %c0_i32_2 = arith.constant 0 : i32
    return %c0_i32, %c0_i32_0, %c0_i32_1 : i32, i32, i32
  }
  func.func @transform_10(%arg0: i32) -> (i32, i32, i32) {
    %c0_i32 = arith.constant 0 : i32
    %c0_i32_0 = arith.constant 0 : i32
    %c0_i32_1 = arith.constant 0 : i32
    %c0_i32_2 = arith.constant 0 : i32
    return %c0_i32, %c0_i32_0, %c0_i32_1 : i32, i32, i32
  }
  func.func @transform_11(%arg0: i32) -> (i32, i32, i32) {
    %c0_i32 = arith.constant 0 : i32
    %c0_i32_0 = arith.constant 0 : i32
    %c0_i32_1 = arith.constant 0 : i32
    %c0_i32_2 = arith.constant 0 : i32
    return %c0_i32, %c0_i32_0, %c0_i32_1 : i32, i32, i32
  }
  func.func @transform_12(%arg0: i32) -> (i32, i32, i32) {
    %c0_i32 = arith.constant 0 : i32
    %c0_i32_0 = arith.constant 0 : i32
    %c0_i32_1 = arith.constant 0 : i32
    %c0_i32_2 = arith.constant 0 : i32
    return %c0_i32, %c0_i32_0, %c0_i32_1 : i32, i32, i32
  }
  func.func @transform_13(%arg0: i32) -> (i32, i32, i32) {
    %c0_i32 = arith.constant 0 : i32
    %c0_i32_0 = arith.constant 0 : i32
    %c0_i32_1 = arith.constant 0 : i32
    %c0_i32_2 = arith.constant 0 : i32
    return %c0_i32, %c0_i32_0, %c0_i32_1 : i32, i32, i32
  }
  func.func @transform_14(%arg0: i32) -> (i32, i32, i32) {
    %c0_i32 = arith.constant 0 : i32
    %c0_i32_0 = arith.constant 0 : i32
    %c0_i32_1 = arith.constant 0 : i32
    %c0_i32_2 = arith.constant 0 : i32
    return %c0_i32, %c0_i32_0, %c0_i32_1 : i32, i32, i32
  }
  func.func @transform_15(%arg0: i32) -> (i32, i32) {
    %c0_i32 = arith.constant 0 : i32
    %c0_i32_0 = arith.constant 0 : i32
    %c0_i32_1 = arith.constant 0 : i32
    return %c0_i32, %c0_i32_0 : i32, i32
  }
  func.func @transform_16(%arg0: i32) -> (i32, i32) {
    %c0_i32 = arith.constant 0 : i32
    %c0_i32_0 = arith.constant 0 : i32
    %c0_i32_1 = arith.constant 0 : i32
    return %c0_i32, %c0_i32_0 : i32, i32
  }
  func.func @transform_17(%arg0: i32) -> (i32, i32, i32) {
    %c0_i32 = arith.constant 0 : i32
    %c0_i32_0 = arith.constant 0 : i32
    %c0_i32_1 = arith.constant 0 : i32
    return %arg0, %c0_i32, %c0_i32_0 : i32, i32, i32
  }
}

</mosaic_0001>

<bundles_post_ra>
// kernel: vision_encoder_forward.1
= control target key start
LH: loop header
LB: loop body
LE: loop exit
PB: predicated region body
PF: predicated region fallthrough
CT: control target
= control target key end

     0   :  { %s4598_s0 = inlined_call_operand.vmem [shape: bf16[2,5,768], index: 0, kind: input, shape index: {}]   ;;  %s4599_s1 = inlined_call_operand.vmem [shape: bf16[768,64], index: 1, kind: input, shape index: {}]   ;;  %s4600_s2 = inlined_call_operand.vmem [shape: f32[5,64], index: 2, kind: input, shape index: {}]   ;;  %s4601_s3 = inlined_call_operand.vmem [shape: f32[2,1,64], index: 3, kind: input, shape index: {}]   ;;  %s4602_s4 = inlined_call_operand.vmem [shape: f32[2,1,64], index: 4, kind: input, shape index: {}]   ;;  %s4603_s5 = inlined_call_operand.vmem [shape: bf16[2,64,192], index: 5, kind: input, shape index: {}]   ;;  %s4604_s6 = inlined_call_operand.vmem [shape: f32[2,1,192], index: 6, kind: input, shape index: {}]   ;;  %s4605_s7 = inlined_call_operand.vmem [shape: bf16[2,64,64], index: 7, kind: input, shape index: {}]   ;;  %s4606_s8 = inlined_call_operand.vmem [shape: f32[2,1,64], index: 8, kind: input, shape index: {}]   ;;  %s4607_s9 = inlined_call_operand.vmem [shape: f32[2,1,64], index: 9, kind: input, shape index: {}]   ;;  %s4608_s10 = inlined_call_operand.vmem [shape: f32[2,1,64], index: 10, kind: input, shape index: {}]   ;;  %s4609_s11 = inlined_call_operand.vmem [shape: bf16[2,64,128], index: 11, kind: input, shape index: {}]   ;;  %s4610_s12 = inlined_call_operand.vmem [shape: f32[2,1,128], index: 12, kind: input, shape index: {}]   ;;  %s4611_s13 = inlined_call_operand.vmem [shape: bf16[2,128,64], index: 13, kind: input, shape index: {}]   ;;  %s4612_s14 = inlined_call_operand.vmem [shape: f32[2,1,64], index: 14, kind: input, shape index: {}]   ;;  %s4613_s15 = inlined_call_operand.vmem [shape: f32[1,64], index: 15, kind: input, shape index: {}]   ;;  %s4614_s16 = inlined_call_operand.vmem [shape: f32[1,64], index: 16, kind: input, shape index: {}]   ;;  %s4615_s17 = inlined_call_operand.hbm [shape: f32[2,1,64], index: 17, kind: output, shape index: {}]  }
   0x1   :  { %4634 = sst [smem:[#allocation11_spill]] %s4598_s0 }
   0x2   :  { %4635 = sst [smem:[#allocation12_spill]] %s4599_s1 }
   0x3   :  { %4636 = sst [smem:[#allocation13_spill]] %s4600_s2 }
   0x4   :  { %4637 = sst [smem:[#allocation14_spill]] %s4601_s3 }
   0x5   :  { %4638 = sst [smem:[#allocation15_spill]] %s4615_s17 }
   0x6   :  { %22 = vsyncpa [#allocation3], 0 }
   0x7   :  { %24 = vsyncpa [#allocation3 + $0x1], 0  ;;  %s3924_s24 = smov 0   ;;  %s3926_s25 = smov 0  }
   0x8   :  { %s3928_s26 = smov 0   ;;  %s3930_s27 = smov 0  }
   0x9 LB: > { %4639 = sst [smem:[#allocation5_spill]] %s3808_s24  ;;  %s3945_s28 = sadd.s32 4294967295, %s3820_s27   ;;  %s3820_s27 = sphi %s3930_s27, %s4661_s27   ;;  %s3816_s26 = sphi %s3928_s26, %s4663_s26   ;;  %s3812_s25 = sphi %s3926_s25, %s4665_s25   ;;  %s3808_s24 = sphi %s3924_s24, %s4664_s24  }
   0xa   : > { %4640 = sst [smem:[#allocation6_spill]] %s3816_s26  ;;  %s3035_s29 = sadd.s32 4294967294, %s3820_s27  }
   0xb   : > { %4641 = sst [smem:[#allocation7_spill]] %s3820_s27  ;;  %s3949_s0 = sadd.s32 1, %s3820_s27  }
   0xc   : > { %4642 = sst [smem:[#allocation8_spill]] %s3949_s0  ;;  %s399_s30 = sadd.s32 1, %s3816_s26 }
   0xd   : > { %s396_s18 = ssub.s32 %s3820_s27, %s3949_s0  ;;  %p409_p0 = scmp.ne.s32.totalorder %s3816_s26, %s3812_s25 }
   0xe   : > { %p397_p1 = scmp.eq.s32.totalorder %s396_s18, 0  ;;  %p410_p2 = scmp.eq.s32.totalorder %s3945_s28, 1 }
   0xf   : > { %p415_p3 = scmp.ne.s32.totalorder %s3812_s25, %s3808_s24  ;;  %p416_p4 = scmp.eq.s32.totalorder %s3035_s29, 1 }
  0x10   : > { %s3960_s19 = scalar_select %p397_p1, %s3816_s26, %s399_s30  }
  0x11   : > { %p3962_p5 = por %p410_p2, %p409_p0  ;;  %p3966_p6 = por %p416_p4, %p415_p3 }
  0x12   : > { %4643 = sst [smem:[#allocation9_spill]] %s3960_s19  ;;  %p3038_p7 = scmp.ge.s32.totalorder %s3820_s27, 1 }
  0x13   : > { %s4645_s20 = scalar_select %p3966_p6, 1, 0 }
  0x14   : > { %p490_p8 = scmp.lt.s32.totalorder %s3820_s27, 3 }
  0x15   : > { %4646 = sst [smem:[#allocation10_spill]] %s4645_s20 }
  0x16   : > { %p491_p9 = pnand %p3038_p7, %p490_p8 }
  0x17   : > { %s4647_s23 = sld [smem:[#allocation12_spill]] (!%p491_p9)  ;;  %p541_p10 = scmp.lt.s32.totalorder (!%p491_p9), %s3945_s28, 1 }
  0x18   : > { %494 = sbr.rel (%p491_p9) target bundleno = 5446 (0x1546), region = 88  ;;  %s4648_s17 = sld [smem:[#allocation11_spill]] (!%p491_p9) }
  0x19   : > { %s4649_s2 = sld [smem:[#allocation13_spill]] (!%p491_p9)  ;;  %s4630_s0 = smov (!%p491_p9), 32  }
  0x1a   : > { %s4650_s3 = sld [smem:[#allocation14_spill]] (!%p491_p9)  ;;  %s4626_s24 = smov (!%p491_p9), 112  }
  0x1b   : > { %s4632_s20 = smov (!%p491_p9), 16   ;;  %s4628_s21 = smov (!%p491_p9), 80  }
  0x1c   : > { %s4651_s29 = smov (!%p491_p9), 16   ;;  %s4652_s19 = smov (!%p491_p9), 32  }
  0x1d   : > { %v3600_v0 = vld [vmem:[%s4647_s23 + $0x78] sm:$0xff]   ;;  %v3604_v4 = vld [vmem:[%s4647_s23 + $0x70] sm:$0xff]   ;;  %v3608_v8 = vld [vmem:[%s4647_s23 + $0x68] sm:$0xff]   ;;  %s542_s18 = scalar_select %p541_p10, %s3945_s28, 1  ;;  %vm1078_vm0 = vcmask 520192   ;;  %vm1168_vm1 = vcmask 523264  }
  0x1e   : > { %v3601_v1 = vld [vmem:[%s4647_s23 + $0x38] sm:$0xff]   ;;  %3229 = vmatprep.subr.bf16.mxu0 %v3600_v0  ;;  %v3605_v5 = vld [vmem:[%s4647_s23 + $0x30] sm:$0xff]   ;;  %v3609_v9 = vld [vmem:[%s4647_s23 + $0x28] sm:$0xff]   ;;  %vm3824_vm2 = vmmov 0   ;;  %vm1218_vm3 = vcmask 130048   ;;  %vm1468_vm4 = vcmask 1041408  }
  0x1f   : > { %v3602_v2 = vld [vmem:[%s4647_s23 + $0xf8] sm:$0xff]   ;;  %3230 = vmatpush3.bf16.msra.mxu0 %v3601_v1  ;;  %v3606_v6 = vld [vmem:[%s4647_s23 + $0xf0] sm:$0xff]   ;;  %v3610_v10 = vld [vmem:[%s4647_s23 + $0xe8] sm:$0xff]   ;;  %s3549_s22 = smul.u32 24, %s542_s18  ;;  %s4624_s18 = smov 96   ;;  %vm1469_vm5 = vcmask 1042432  }
  0x20   : > { %v3603_v3 = vld [vmem:[%s4647_s23 + $0xb8] sm:$0xff]   ;;  %3251 = vmatprep.subr.bf16.mxu1 %v3602_v2  ;;  %3231 = vmatprep.subr.bf16.mxu0 %v3604_v4  ;;  %v3607_v7 = vld [vmem:[%s4647_s23 + $0xb0] sm:$0xff]   ;;  %v3611_v11 = vld [vmem:[%s4647_s23 + $0xa8] sm:$0xff]   ;;  %vm1415_vm6 = vcmask 36864   ;;  %vm1464_vm7 = vcmask 39936   ;;  %vm1673_vm8 = vcmask 261120  }
  0x21   : > { %3252 = vmatpush3.bf16.msra.mxu1 %v3603_v3  ;;  %v3612_v12 = vld [vmem:[%s4647_s23 + $0x60] sm:$0xff]   ;;  %v3616_v16 = vld [vmem:[%s4647_s23 + $0x58] sm:$0xff]   ;;  %v3620_v20 = vld [vmem:[%s4647_s23 + $0x50] sm:$0xff]   ;;  %s4064_s27 = scalar_lea.vmem %s4648_s17, %s3549_s22  ;;  %s3826_s17 = smov 64   ;;  %vm1675_vm9 = vcmask 392192   ;;  %vm2950_vm12 = vcmask 516096  }
  0x22   : > { %3253 = vmatprep.subr.bf16.mxu1 %v3606_v6  ;;  %v3613_v13 = vld [vmem:[%s4647_s23 + $0x20] sm:$0xff]   ;;  %v3617_v17 = vld [vmem:[%s4647_s23 + $0x18] sm:$0xff]   ;;  %v3621_v21 = vld [vmem:[%s4647_s23 + $0x10] sm:$0xff]   ;;  %s3827_s22 = smov 48  }
  0x23   : > { %3232 = vmatpush3.bf16.msra.mxu0 %v3605_v5  ;;  %v3614_v14 = vld [vmem:[%s4647_s23 + $0xe0] sm:$0xff]   ;;  %v3618_v18 = vld [vmem:[%s4647_s23 + $0xd8] sm:$0xff]   ;;  %v3622_v22 = vld [vmem:[%s4647_s23 + $0xd0] sm:$0xff]  }
  0x24   : > { %3233 = vmatprep.subr.bf16.mxu0 %v3608_v8  ;;  %v3615_v15 = vld [vmem:[%s4647_s23 + $0xa0] sm:$0xff]   ;;  %v3619_v19 = vld [vmem:[%s4647_s23 + $0x98] sm:$0xff]   ;;  %v3623_v23 = vld [vmem:[%s4647_s23 + $0x90] sm:$0xff]  }
  0x25   : > { %3254 = vmatpush3.bf16.msra.mxu1 %v3607_v7  ;;  %v3624_v24 = vld [vmem:[%s4647_s23 + $0x48] sm:$0xff]   ;;  %v3628_v28 = vld [vmem:[%s4647_s23 + $0x40] sm:$0xff]   ;;  %v3634_v35 = vld [vmem:[%s4647_s23 + $0x178] sm:$0xff]  }
  0x26   : > { %3255 = vmatprep.subr.bf16.mxu1 %v3610_v10  ;;  %v3625_v25 = vld [vmem:[%s4647_s23 + $0x8] sm:$0xff]   ;;  %v3629_v29 = vld [vmem:[%s4647_s23] sm:$0xff]   ;;  %v3637_v39 = vld [vmem:[%s4647_s23 + $0x138] sm:$0xff]  }
  0x27   : > { %3234 = vmatpush3.bf16.msra.mxu0 %v3609_v9  ;;  %v3626_v26 = vld [vmem:[%s4647_s23 + $0xc8] sm:$0xff]   ;;  %v3630_v30 = vld [vmem:[%s4647_s23 + $0xc0] sm:$0xff]   ;;  %v3638_v40 = vld [vmem:[%s4647_s23 + $0x170] sm:$0xff]  }
  0x28   : > { %3235 = vmatprep.subr.bf16.mxu0 %v3612_v12  ;;  %v3627_v27 = vld [vmem:[%s4647_s23 + $0x88] sm:$0xff]   ;;  %v547_v31 = vld [vmem:[%s4064_s27] sm:$0x77]  ;;  %v3639_v41 = vld [vmem:[%s4647_s23 + $0x130] sm:$0xff]  }
  0x29   : > { %3256 = vmatpush3.bf16.msra.mxu1 %v3611_v11  ;;  %v3040_v32 = vcombine.low %v547_v31, %v547_v31  ;;  %v3041_v33 = vcombine.high %v547_v31, %v547_v31  ;;  %v3633_v34 = vld [vmem:[%s4647_s23 + $0x80] sm:$0xff]   ;;  %v548_v36 = vld [vmem:[%s4064_s27 + $0x8] sm:$0x77]  ;;  %v3644_v46 = vld [vmem:[%s4647_s23 + $0x158] sm:$0xff]  }
  0x2a   : > { %3257 = vmatprep.subr.bf16.mxu1 %v3614_v14  ;;  %v3042_v37 = vcombine.low %v548_v36, %v548_v36  ;;  %v3043_v38 = vcombine.high %v548_v36, %v548_v36  ;;  %v3640_v42 = vld [vmem:[%s4647_s23 + $0x168] sm:$0xff]   ;;  %v3642_v44 = vld [vmem:[%s4647_s23 + $0x160] sm:$0xff]   ;;  %v3645_v47 = vld [vmem:[%s4647_s23 + $0x118] sm:$0xff]  }
  0x2b   : > { %3236 = vmatpush3.bf16.msra.mxu0 %v3613_v13  ;;  %988 = vmatprep.mubr.bf16.mxu0 %v3041_v33  ;;  %v3641_v43 = vld [vmem:[%s4647_s23 + $0x128] sm:$0xff]   ;;  %v3643_v45 = vld [vmem:[%s4647_s23 + $0x120] sm:$0xff]   ;;  %v3646_v48 = vld [vmem:[%s4647_s23 + $0x150] sm:$0xff]  }
  0x2c   : > { %3237 = vmatprep.subr.bf16.mxu0 %v3616_v16  ;;  %1028 = vmatprep.mubr.bf16.mxu1 %v3043_v38  ;;  %v549_v49 = vld [vmem:[%s4064_s27 + $0x10] sm:$0x77]  ;;  %v3648_v52 = vld [vmem:[%s4647_s23 + $0x148] sm:$0xff]   ;;  %v3650_v54 = vld [vmem:[%s4647_s23 + $0x140] sm:$0xff]   ;;  %s4656_s27 = sld [smem:[#allocation15_spill]] }
  0x2d   : > { %3258 = vmatpush3.bf16.msra.mxu1 %v3615_v15  ;;  %v3045_v50 = vcombine.high %v549_v49, %v549_v49  ;;  %v3647_v51 = vld [vmem:[%s4647_s23 + $0x110] sm:$0xff]   ;;  %v3649_v53 = vld [vmem:[%s4647_s23 + $0x108] sm:$0xff]   ;;  %v3651_v55 = vld [vmem:[%s4647_s23 + $0x100] sm:$0xff]   ;;  %v3044_v56 = vcombine.low %v549_v49, %v549_v49 }
  0x2e   : > { %3259 = vmatprep.subr.bf16.mxu1 %v3618_v18  ;;  %v646_v2 = vld [vmem:[%s4649_s2] sm:$0x1f]  ;;  %v3656_v18 = vld [vmem:[%s4603_s5 + $0x34] ss:$8 sps:$4 sm:$0xff]  }
  0x2f   : > { %3238 = vmatpush3.bf16.msra.mxu0 %v3617_v17  ;;  %v3094_v31 = vld [vmem:[%s4650_s3] ss:$0 sm:$0xff] }
  0x30   : > { %3239 = vmatprep.subr.bf16.mxu0 %v3620_v20  ;;  %v3659_v20 = vld [vmem:[%s4603_s5 + $0x24] ss:$8 sps:$4 sm:$0xff]   ;;  %v3095_v33 = vld [vmem:[%s4602_s4] ss:$0 sm:$0xff] }
  0x31   : > { %3260 = vmatpush3.bf16.msra.mxu1 %v3619_v19  ;;  %v3654_v19 = vld [vmem:[%s4603_s5 + $0x30] ss:$8 sps:$4 sm:$0xff]  }
  0x32   : > { %3261 = vmatprep.subr.bf16.mxu1 %v3622_v22  ;;  %v3662_v22 = vld [vmem:[%s4603_s5 + $0x14] ss:$8 sps:$4 sm:$0xff]   ;;  %s4657_s2 = smov %s4656_s27 }
  0x33   : > { %3240 = vmatpush3.bf16.msra.mxu0 %v3621_v21  ;;  %v3657_v21 = vld [vmem:[%s4603_s5 + $0x20] ss:$8 sps:$4 sm:$0xff]  }
  0x34   : > { %3241 = vmatprep.subr.bf16.mxu0 %v3624_v24  ;;  %v3665_v24 = vld [vmem:[%s4603_s5 + $0x4] ss:$8 sps:$4 sm:$0xff]  }
  0x35   : > { %3262 = vmatpush3.bf16.msra.mxu1 %v3623_v23  ;;  %v3660_v23 = vld [vmem:[%s4603_s5 + $0x10] ss:$8 sps:$4 sm:$0xff]  }
  0x36   : > { %3263 = vmatprep.subr.bf16.mxu1 %v3626_v26  ;;  %v3822_v26 = vmov 0  }
  0x37   : > { %3242 = vmatpush3.bf16.msra.mxu0 %v3625_v25  ;;  %v3663_v25 = vld [vmem:[%s4603_s5] ss:$8 sps:$4 sm:$0xff]  }
  0x38   : > { %3243 = vmatprep.subr.bf16.mxu0 %v3628_v28 }
  0x39   : > { %3264 = vmatpush3.bf16.msra.mxu1 %v3627_v27 }
  0x3a   : > { %3265 = vmatprep.subr.bf16.mxu1 %v3630_v30 }
  0x3b   : > { %3244 = vmatpush3.bf16.msra.mxu0 %v3629_v29 }
  0x3c   : > { %3273 = vmatprep.subr.bf16.mxu0 %v3634_v35 }
  0x3d   : > { %3266 = vmatpush3.bf16.msra.mxu1 %v3633_v34 }
  0x3e   : > { %989 = vmatmul.mubr.bf16.vlgmr.msra.gmra.mxu0 %v3040_v32  ;;  %1180 = vmatprep.subr.bf16.mxu1 %v3656_v18 }
  0x3f   : > { %3274 = vmatpush3.bf16.msra.mxu0 %v3637_v39  ;;  %1068 = vmatprep.mubr.bf16.mxu0 %v3045_v50  ;;  %v3823_v39 = vmov 0.0  }
  0x40   : > { %1029 = vmatmul.mubr.bf16.vlgmr.msra.gmra.mxu1 %v3042_v37  ;;  %3275 = vmatprep.subr.bf16.mxu0 %v3638_v40  ;;  %v1118_v37 = vlaneseq }
  0x41   : > { %1181 = vmatpush1.bf16.msra.mxu1 %v3654_v19  ;;  %1204 = vmatprep.mubr.bf16.mxu1 %v3822_v26 }
  0x42   : > { %1182 = vmatprep.subr.bf16.mxu1 %v3659_v20  ;;  %v4167_v38 = vshrl.u32 %v1118_v37, 7 }
  0x43   : > { %3276 = vmatpush3.bf16.msra.mxu0 %v3639_v41  ;;  %v1116_v41 = vld [vmem:[%s4604_s6] sm:$0x3] }
  0x44   : > { %3277 = vmatprep.subr.bf16.mxu0 %v3640_v42  ;;  %v1120_v40 = vsub.s32 0, %v4167_v38  ;;  %v1124_v49 = vsub.s32 1, %v4167_v38 }
  0x45   : > { %1183 = vmatpush1.bf16.msra.mxu1 %v3657_v21 }
  0x46   : > { %1184 = vmatprep.subr.bf16.mxu1 %v3662_v22  ;;  %v1121_v42 = vrot.slane %v1116_v41, %v1120_v40 }
  0x47   : > { %3278 = vmatpush3.bf16.msra.mxu0 %v3641_v43 }
  0x48   : > { %3279 = vmatprep.subr.bf16.mxu0 %v3642_v44 }
  0x49   : > { %1185 = vmatpush1.bf16.msra.mxu1 %v3660_v23 }
  0x4a   : > { %1186 = vmatprep.subr.bf16.mxu1 %v3665_v24 }
  0x4b   : > { %3280 = vmatpush3.bf16.msra.mxu0 %v3643_v45 }
  0x4c   : > { %3281 = vmatprep.subr.bf16.mxu0 %v3644_v46 }
  0x4d   : > { %1187 = vmatpush1.bf16.msra.mxu1 %v3663_v25 }
  0x4e   : > { %3365 = vmatprep.subr.bf16.mxu1 %v3823_v39 }
  0x4f   : > { %3282 = vmatpush3.bf16.msra.mxu0 %v3645_v47 }
  0x50   : > { %3283 = vmatprep.subr.bf16.mxu0 %v3646_v48 }
  0x53   : > { %3284 = vmatpush3.bf16.msra.mxu0 %v3647_v51 }
  0x54   : > { %3285 = vmatprep.subr.bf16.mxu0 %v3648_v52 }
  0x57   : > { %3286 = vmatpush3.bf16.msra.mxu0 %v3649_v53 }
  0x58   : > { %3287 = vmatprep.subr.bf16.mxu0 %v3650_v54  ;;  %v1125_v54 = vrot.slane %v1116_v41, %v1124_v49 }
  0x5b   : > { %3288 = vmatpush3.bf16.msra.mxu0 %v3651_v55 }
  0x5c   : > { %3377 = vmatprep.subr.bf16.mxu0 %v3823_v39 }
  0x5e   : > { %1069 = vmatmul.mubr.bf16.vlgmr.msra.gmra.mxu0 %v3044_v56 }
  0x5f   : > { %3379 = vmatprep.mubr.msk.bf16.mxu0 %vm3824_vm2, %v3823_v39 }
  0xfe   : > { %v3245_v57 = vpop.f32.mrf.mxu0 }
 0x100   : > { %v3246_v58 = vpop.f32.mrf.mxu0  ;;  %v3267_v59 = vpop.f32.mrf.mxu1 }
 0x101   : > { %v3247_v1 = vadd.f32 %v3246_v58, %v3245_v57 }
 0x102   : > { %v3248_v60 = vpop.f32.mrf.mxu0  ;;  %v3268_v61 = vpop.f32.mrf.mxu1 }
 0x103   : > { %v991_v3 = vadd.f32 %v3247_v1, %v646_v2  ;;  %v3269_v4 = vadd.f32 %v3268_v61, %v3267_v59  ;;  %v3832_v59 = vmov 65535  }
 0x104   : > { %v3249_v62 = vpop.f32.mrf.mxu0  ;;  %v3270_v63 = vpop.f32.mrf.mxu1  ;;  %v1470_v60 = vsel %vm1468_vm4, 4294967295, %v3832_v59 }
 0x105   : > { %v1031_v7 = vadd.f32 %v3269_v4, %v991_v3  ;;  %v4202_v63 = vsel %vm1469_vm5, %v1470_v60, 0 }
 0x106   : > { %v3271_v0 = vpop.f32.mrf.mxu1 }
 0x11e   : > { %v3289_v5 = vpop.f32.mrf.mxu0 }
 0x120   : > { %v3290_v6 = vpop.f32.mrf.mxu0 }
 0x121   : > { %v3291_v8 = vadd.f32 %v3290_v6, %v3289_v5 }
 0x122   : > { %v3292_v9 = vpop.f32.mrf.mxu0 }
 0x123   : > { %v4129_v10 = vadd.f32 %v3291_v8, %v1031_v7 }
 0x124   : > { %v3293_v11 = vpop.f32.mrf.mxu0 }
 0x125   : > { %v1079_v12 = vsel %vm1078_vm0, %v4129_v10, 0.0 }
 0x126   : > { %1080 = vadd.xlane.f32.xlu0 %v1079_v12 }
 0x1af   : > { %v1081_v13 = vpop.xlane.xlu0 %1080 }
 0x1b0   : > { %v1083_v14 = vmul.f32 0.015625, %v1081_v13 }
 0x1b2   : > { %v1084_v15 = vsub.f32 %v4129_v10, %v1083_v14 }
 0x1b4   : > { %v1085_v16 = vmul.f32 %v1084_v15, %v1084_v15 }
 0x1b6   : > { %v1086_v17 = vsel %vm1078_vm0, %v1085_v16, 0.0 }
 0x1b7   : > { %1087 = vadd.xlane.f32.xlu0 %v1086_v17 }
 0x240   : > { %v1088_v27 = vpop.xlane.xlu0 %1087 }
 0x241   : > { %v1089_v28 = vmul.f32 0.015625, %v1088_v27 }
 0x243   : > { %v1090_v29 = vadd.f32 1e-06, %v1089_v28 }
 0x245   : > { %3710 = vrsqrt.f32 %v1090_v29 }
 0x252   : > { %v3711_v30 = vpop.eup %3710 }
 0x253   : > { %v1092_v32 = vmul.f32 %v3711_v30, %v1084_v15 }
 0x255   : > { %v1099_v34 = vmul.f32 %v3094_v31, %v1092_v32 }
 0x257   : > { %v1106_v35 = vadd.f32 %v3095_v33, %v1099_v34 }
 0x259   : > { %v1107_v36 = vpack.c.bf16 %v1106_v35, %v1106_v35 }
 0x25b   : > { %3104 = vmatmul.mubr.msk.bf16.vlgmr.msra.gmra.mxu1 %vm1168_vm1, %v1107_v36 }
 0x25c   : > { %3367 = vmatprep.mubr.msk.bf16.mxu1 %vm3824_vm2, %v3823_v39 }
 0x31b   : > { %v1206_v43 = vpop.f32.mrf.mxu1 }
 0x31c   : > { %v1207_v44 = vadd.f32 %v1206_v43, %v1121_v42 }
 0x31d   : > { %v1208_v45 = vpop.f32.mrf.mxu1 }
 0x31e   : > { %v1213_v46 = vpack.c.bf16 %v1207_v44, %v1207_v44  ;;  %v1209_v56 = vadd.f32 %v1208_v45, %v1125_v54 }
 0x31f   : > { %v1210_v47 = vpop.f32.mrf.mxu1 }
 0x320   : > { %1317 = vrot.lane.b32.xlu0 %v1213_v46, %s4630_s0  ;;  %1216 = vrot.lane.b32.xlu1 %v1213_v46, %s3826_s17  ;;  %v4200_v61 = vpack.c.bf16 %v1209_v56, %v1209_v56 }
 0x321   : > { %v1211_v48 = vpop.f32.mrf.mxu1 }
 0x322   : > { %v1473_v1 = vand.u32 %v4202_v63, %v4200_v61 }
 0x324   : > { %1267 = vrot.lane.b32.xlu1 %v1213_v46, %s3827_s22 }
 0x328   : > { %1265 = vrot.lane.b32.xlu1 %v1213_v46, %s4626_s24 }
 0x32c   : > { %1367 = vrot.lane.b32.xlu1 %v1213_v46, %s4632_s20 }
 0x330   : > { %1315 = vrot.lane.b32.xlu1 %v1213_v46, %s4624_s18 }
 0x334   : > { %1365 = vrot.lane.b32.xlu1 %v1213_v46, %s4628_s21 }
 0x392   : > { %v1318_v50 = vpop.permute.xlu0 %1317  ;;  %v1217_v51 = vpop.permute.xlu1 %1216 }
 0x393   : > { %v1323_v52 = vsel %vm1218_vm3, %v1318_v50, 0  ;;  %v1223_v53 = vsel %vm1218_vm3, %v1217_v51, 0 }
 0x394   : > { %3366 = vmatpush3.bf16.xpose.msra.mxu1 %v1223_v53  ;;  %3378 = vmatpush3.bf16.xpose.msra.mxu0 %v1323_v52 }
 0x395   : > { %3371 = vmatprep.subr.bf16.mxu1 %v3823_v39  ;;  %3389 = vmatprep.subr.bf16.mxu0 %v3823_v39 }
 0x396   : > { %v1268_v55 = vpop.permute.xlu1 %1267 }
 0x397   : > { %v1273_v58 = vsel %vm1218_vm3, %v1268_v55, 0 }
 0x39a   : > { %v1266_v57 = vpop.permute.xlu1 %1265 }
 0x39b   : > { %3368 = vmatmul.mubr.msk.bf16.vlgmr.msra.gmra.mxu1 %vm1218_vm3, %v1213_v46 }
 0x39c   : > { %3372 = vmatpush3.bf16.xpose.msra.mxu1 %v1273_v58  ;;  %3373 = vmatprep.mubr.msk.bf16.mxu1 %vm3824_vm2, %v3823_v39 }
 0x39d   : > { %3383 = vmatprep.subr.bf16.mxu1 %v3823_v39 }
 0x39e   : > { %v1368_v62 = vpop.permute.xlu1 %1367 }
 0x39f   : > { %v1373_v2 = vsel %vm1218_vm3, %v1368_v62, 0 }
 0x3a2   : > { %v1316_v0 = vpop.permute.xlu1 %1315 }
 0x3a3   : > { %3374 = vmatmul.mubr.msk.bf16.vlgmr.msra.gmra.mxu1 %vm1218_vm3, %v1266_v57  ;;  %3380 = vmatmul.mubr.msk.bf16.vlgmr.msra.gmra.mxu0 %vm1218_vm3, %v1316_v0 }
 0x3a4   : > { %3390 = vmatpush3.bf16.msra.mxu0 %v1473_v1  ;;  %3384 = vmatpush3.bf16.xpose.msra.mxu1 %v1373_v2 }
 0x3a5   : > { %3385 = vmatprep.mubr.msk.bf16.mxu1 %vm3824_vm2, %v3823_v39  ;;  %3395 = vmatprep.subr.bf16.mxu1 %v3823_v39 }
 0x3a6   : > { %3391 = vmatprep.mubr.msk.bf16.mxu0 %vm3824_vm2, %v3823_v39  ;;  %3401 = vmatprep.subr.bf16.mxu0 %v3823_v39  ;;  %v1366_v3 = vpop.permute.xlu1 %1365 }
 0x3ab   : > { %3386 = vmatmul.mubr.msk.bf16.vlgmr.msra.gmra.mxu1 %vm1218_vm3, %v1366_v3 }
 0x3ac   : > { %3397 = vmatprep.mubr.msk.bf16.mxu1 %vm3824_vm2, %v3823_v39 }
 0x45b   : > { %v1259_v4 = vpop.f32.mrf.mxu1 }
 0x45c   : > { %v1416_v5 = vsel %vm1415_vm6, %v1259_v4, -inf }
 0x45d   : > { %1417 = vmax.xlane.f32.xlu1 %v1416_v5  ;;  %v3369_v6 = vpop.f32.mrf.mxu1 }
 0x45f   : > { %v1262_v7 = vpop.f32.mrf.mxu1 }
 0x461   : > { %v3370_v8 = vpop.f32.mrf.mxu1 }
 0x463   : > { %v1309_v9 = vpop.f32.mrf.mxu1  ;;  %v1359_v11 = vpop.f32.mrf.mxu0 }
 0x464   : > { %v1419_v12 = vsel %vm1415_vm6, %v1309_v9, -inf  ;;  %v1422_v13 = vsel %vm1415_vm6, %v1359_v11, -inf }
 0x465   : > { %1420 = vmax.xlane.f32.xlu0 %v1419_v12  ;;  %v3375_v14 = vpop.f32.mrf.mxu1  ;;  %1423 = vmax.xlane.f32.xlu1 %v1422_v13  ;;  %v3381_v15 = vpop.f32.mrf.mxu0  ;;  %v3668_v12 = vld [vmem:[%s4605_s7 + $0x8] sm:$0xff]  }
 0x466   : > { %v3669_v15 = vld [vmem:[%s4605_s7] sm:$0xff]  }
 0x467   : > { %v1312_v16 = vpop.f32.mrf.mxu1  ;;  %v1362_v17 = vpop.f32.mrf.mxu0 }
 0x469   : > { %v3376_v18 = vpop.f32.mrf.mxu1  ;;  %v3382_v19 = vpop.f32.mrf.mxu0 }
 0x46b   : > { %v1409_v20 = vpop.f32.mrf.mxu1 }
 0x46c   : > { %v1425_v21 = vsel %vm1415_vm6, %v1409_v20, -inf }
 0x46d   : > { %1426 = vmax.xlane.f32.xlu0 %v1425_v21  ;;  %v3387_v22 = vpop.f32.mrf.mxu1 }
 0x46f   : > { %v1412_v23 = vpop.f32.mrf.mxu1 }
 0x471   : > { %v3388_v24 = vpop.f32.mrf.mxu1 }
 0x476   : > { %1516 = vrot.lane.b32.xlu1 %v4200_v61, %s4626_s24  ;;  %s4653_s24 = smov 80  }
 0x4e6   : > { %v1418_v25 = vpop.xlane.xlu1 %1417 }
 0x4e7   : > { %v1428_v27 = vsub.f32 %v1259_v4, %v1418_v25 }
 0x4e9   : > { %v1432_v28 = vmul.f32 1.442695, %v1428_v27 }
 0x4eb   : > { %3712 = vpow2.f32 %v1432_v28 }
 0x4ee   : > { %v1421_v29 = vpop.xlane.xlu0 %1420  ;;  %v1424_v30 = vpop.xlane.xlu1 %1423 }
 0x4ef   : > { %v1429_v31 = vsub.f32 %v1309_v9, %v1421_v29  ;;  %v1430_v32 = vsub.f32 %v1359_v11, %v1424_v30  ;;  %v3666_v9 = vld [vmem:[%s4605_s7 + $0x18] sm:$0xff]   ;;  %v3667_v11 = vld [vmem:[%s4605_s7 + $0x10] sm:$0xff]  }
 0x4f1   : > { %v1434_v33 = vmul.f32 1.442695, %v1429_v31  ;;  %v1436_v34 = vmul.f32 1.442695, %v1430_v32 }
 0x4f2   : > { %v1517_v35 = vpop.permute.xlu1 %1516 }
 0x4f3   : > { %3714 = vpow2.f32 %v1434_v33  ;;  %v1522_v36 = vand.u32 %v1517_v35, %v4202_v63 }
 0x4f4   : > { %3716 = vpow2.f32 %v1436_v34 }
 0x4f5   : > { %3396 = vmatpush3.bf16.msra.mxu1 %v1522_v36 }
 0x4f6   : > { %v1427_v37 = vpop.xlane.xlu0 %1426  ;;  %3407 = vmatprep.subr.bf16.mxu1 %v3823_v39 }
 0x4f7   : > { %v1431_v41 = vsub.f32 %v1409_v20, %v1427_v37 }
 0x4f8   : > { %v3713_v42 = vpop.eup %3712 }
 0x4f9   : > { %v1438_v43 = vmul.f32 1.442695, %v1431_v41  ;;  %v1440_v44 = vsel %vm1415_vm6, %v3713_v42, 0.0  ;;  %v3113_v41 = vld [vmem:[%s4606_s8] ss:$0 sm:$0xff] }
 0x4fa   : > { %1441 = vadd.xlane.f32.xlu1 %v1440_v44 }
 0x4fb   : > { %3718 = vpow2.f32 %v1438_v43 }
 0x500   : > { %v3715_v45 = vpop.eup %3714 }
 0x501   : > { %v3717_v46 = vpop.eup %3716  ;;  %v1443_v47 = vsel %vm1415_vm6, %v3715_v45, 0.0 }
 0x502   : > { %1444 = vadd.xlane.f32.xlu0 %v1443_v47  ;;  %v1446_v48 = vsel %vm1415_vm6, %v3717_v46, 0.0 }
 0x503   : > { %1447 = vadd.xlane.f32.xlu1 %v1446_v48 }
 0x508   : > { %v3719_v50 = vpop.eup %3718 }
 0x509   : > { %v1449_v51 = vsel %vm1415_vm6, %v3719_v50, 0.0 }
 0x50a   : > { %1450 = vadd.xlane.f32.xlu0 %v1449_v51 }
 0x514   : > { %1612 = vrot.lane.b32.xlu1 %v4200_v61, %s4628_s21  ;;  %s4654_s21 = smov 112  }
 0x520   : > { %1564 = vrot.lane.b32.xlu0 %v4200_v61, %s4624_s18 }
 0x583   : > { %v1442_v52 = vpop.xlane.xlu1 %1441 }
 0x584   : > { %3720 = vrcp.f32 %v1442_v52 }
 0x58b   : > { %v1445_v53 = vpop.xlane.xlu0 %1444 }
 0x58c   : > { %3722 = vrcp.f32 %v1445_v53  ;;  %v1448_v54 = vpop.xlane.xlu1 %1447 }
 0x58d   : > { %3724 = vrcp.f32 %v1448_v54 }
 0x590   : > { %v1613_v0 = vpop.permute.xlu1 %1612 }
 0x591   : > { %v3721_v55 = vpop.eup %3720  ;;  %v1618_v4 = vand.u32 %v1613_v0, %v4202_v63 }
 0x592   : > { %v1456_v56 = vmul.f32 %v3721_v55, %v3713_v42  ;;  %v3670_v55 = vld [vmem:[%s4609_s11 + $0x18] sm:$0xff]  }
 0x593   : > { %v1451_v57 = vpop.xlane.xlu0 %1450 }
 0x594   : > { %3726 = vrcp.f32 %v1451_v57  ;;  %v1460_v58 = vpack.c.bf16 %v1456_v56, %v1456_v56  ;;  %v3672_v56 = vld [vmem:[%s4609_s11 + $0x8] sm:$0xff]   ;;  %v3673_v57 = vld [vmem:[%s4609_s11] sm:$0xff]  }
 0x596   : > { %3392 = vmatmul.mubr.msk.bf16.vlgmr.msra.gmra.mxu0 %vm1464_vm7, %v1460_v58 }
 0x597   : > { %v1565_v59 = vpop.permute.xlu0 %1564  ;;  %3403 = vmatprep.mubr.msk.bf16.mxu0 %vm3824_vm2, %v3823_v39 }
 0x598   : > { %v1570_v60 = vand.u32 %v1565_v59, %v4202_v63 }
 0x599   : > { %v3723_v61 = vpop.eup %3722 }
 0x59a   : > { %v3725_v62 = vpop.eup %3724  ;;  %3402 = vmatpush3.bf16.msra.mxu0 %v1570_v60  ;;  %v1457_v1 = vmul.f32 %v3723_v61, %v3715_v45 }
 0x59b   : > { %v1458_v2 = vmul.f32 %v3725_v62, %v3717_v46  ;;  %3437 = vmatprep.subr.bf16.mxu0 %v3823_v39  ;;  %v3119_v62 = vld [vmem:[%s4607_s9] ss:$0 sm:$0xff] }
 0x59c   : > { %v1461_v3 = vpack.c.bf16 %v1457_v1, %v1457_v1  ;;  %v3120_v1 = vld [vmem:[%s4608_s10] ss:$0 sm:$0xff] }
 0x59d   : > { %v1462_v5 = vpack.c.bf16 %v1458_v2, %v1458_v2 }
 0x59e   : > { %3398 = vmatmul.mubr.msk.bf16.vlgmr.msra.gmra.mxu1 %vm1464_vm7, %v1461_v3 }
 0x59f   : > { %3404 = vmatmul.mubr.msk.bf16.vlgmr.msra.gmra.mxu0 %vm1464_vm7, %v1462_v5  ;;  %3408 = vmatpush3.bf16.msra.mxu1 %v1618_v4  ;;  %v3674_v5 = vld [vmem:[%s4611_s13 + $0x38] sm:$0xff]  }
 0x5a0   : > { %3409 = vmatprep.mubr.msk.bf16.mxu1 %vm3824_vm2, %v3823_v39  ;;  %3413 = vmatprep.subr.bf16.mxu1 %v3823_v39 }
 0x5a1   : > { %v3727_v6 = vpop.eup %3726  ;;  %3453 = vmatprep.mubr.msk.bf16.mxu0 %vm3824_vm2, %v3823_v39  ;;  %3438 = vmatpush3.bf16.msra.mxu0 %v3674_v5  ;;  %v3693_v5 = vld [vmem:[%s4603_s5 + $0x44] ss:$8 sps:$4 sm:$0xff]  }
 0x5a2   : > { %v1459_v7 = vmul.f32 %v3727_v6, %v3719_v50  ;;  %3439 = vmatprep.subr.bf16.mxu0 %v3823_v39  ;;  %v3675_v6 = vld [vmem:[%s4611_s13 + $0x30] sm:$0xff]  }
 0x5a4   : > { %v1463_v8 = vpack.c.bf16 %v1459_v7, %v1459_v7  ;;  %v3676_v7 = vld [vmem:[%s4611_s13 + $0x28] sm:$0xff]  }
 0x5a5   : > { %3440 = vmatpush3.bf16.msra.mxu0 %v3675_v6  ;;  %v3691_v6 = vld [vmem:[%s4603_s5 + $0x40] ss:$8 sps:$4 sm:$0xff]  }
 0x5a6   : > { %3410 = vmatmul.mubr.msk.bf16.vlgmr.msra.gmra.mxu1 %vm1464_vm7, %v1463_v8  ;;  %3441 = vmatprep.subr.bf16.mxu0 %v3823_v39  ;;  %v3678_v8 = vld [vmem:[%s4611_s13 + $0x18] sm:$0xff]  }
 0x5a7   : > { %3421 = vmatprep.mubr.msk.bf16.mxu1 %vm3824_vm2, %v3823_v39  ;;  %3414 = vmatpush3.bf16.msra.mxu1 %v3666_v9  ;;  %v3679_v9 = vld [vmem:[%s4611_s13 + $0x10] sm:$0xff]  }
 0x5a8   : > { %3415 = vmatprep.subr.bf16.mxu1 %v3823_v39 }
 0x5a9   : > { %3442 = vmatpush3.bf16.msra.mxu0 %v3676_v7 }
 0x5aa   : > { %3443 = vmatprep.subr.bf16.mxu0 %v3823_v39 }
 0x5ab   : > { %3416 = vmatpush3.bf16.msra.mxu1 %v3667_v11  ;;  %v3680_v11 = vld [vmem:[%s4611_s13 + $0x8] sm:$0xff]  }
 0x5ac   : > { %3417 = vmatprep.subr.bf16.mxu1 %v3823_v39 }
 0x5af   : > { %3418 = vmatpush3.bf16.msra.mxu1 %v3668_v12  ;;  %v3681_v12 = vld [vmem:[%s4611_s13] sm:$0xff]  }
 0x5b0   : > { %3419 = vmatprep.subr.bf16.mxu1 %v3823_v39 }
 0x5b3   : > { %3420 = vmatpush3.bf16.msra.mxu1 %v3669_v15 }
 0x5b4   : > { %3425 = vmatprep.subr.bf16.mxu1 %v3823_v39 }
 0x656   : > { %v1509_v13 = vpop.f32.mrf.mxu0 }
 0x658   : > { %v3393_v14 = vpop.f32.mrf.mxu0 }
 0x65a   : > { %v1512_v16 = vpop.f32.mrf.mxu0 }
 0x65c   : > { %v3394_v17 = vpop.f32.mrf.mxu0 }
 0x65e   : > { %v1558_v18 = vpop.f32.mrf.mxu1 }
 0x65f   : > { %v1606_v19 = vpop.f32.mrf.mxu0  ;;  %1661 = vrot.lane.b32.xlu1 %v1558_v18, %s4632_s20 }
 0x660   : > { %1665 = vrot.lane.b32.xlu0 %v1606_v19, %s4630_s0  ;;  %v3399_v20 = vpop.f32.mrf.mxu1  ;;  %s4655_s0 = smov 96  }
 0x661   : > { %v3405_v21 = vpop.f32.mrf.mxu0 }
 0x662   : > { %v1561_v22 = vpop.f32.mrf.mxu1 }
 0x663   : > { %v1609_v23 = vpop.f32.mrf.mxu0 }
 0x664   : > { %v3400_v24 = vpop.f32.mrf.mxu1 }
 0x665   : > { %v3406_v25 = vpop.f32.mrf.mxu0 }
 0x666   : > { %v1654_v27 = vpop.f32.mrf.mxu1 }
 0x667   : > { %1669 = vrot.lane.b32.xlu1 %v1654_v27, %s3827_s22 }
 0x668   : > { %v3411_v28 = vpop.f32.mrf.mxu1 }
 0x66a   : > { %v1657_v29 = vpop.f32.mrf.mxu1 }
 0x66c   : > { %v3412_v30 = vpop.f32.mrf.mxu1 }
 0x6d1   : > { %v1662_v31 = vpop.permute.xlu1 %1661 }
 0x6d2   : > { %v1666_v32 = vpop.permute.xlu0 %1665  ;;  %v1672_v33 = vsel %vm1218_vm3, %v1509_v13, %v1662_v31  ;;  %v3121_v13 = vld [vmem:[%s4610_s12] ss:$0 sm:$0xff] }
 0x6d3   : > { %v1674_v34 = vsel %vm1673_vm8, %v1672_v33, %v1666_v32 }
 0x6d9   : > { %v1670_v35 = vpop.permute.xlu1 %1669 }
 0x6da   : > { %v1676_v36 = vsel %vm1675_vm9, %v1674_v34, %v1670_v35 }
 0x6db   : > { %v1677_v37 = vpack.c.bf16 %v1676_v36, %v1676_v36 }
 0x6dd   : > { %3422 = vmatmul.mubr.msk.bf16.vlgmr.msra.gmra.mxu1 %vm1168_vm1, %v1677_v37 }
 0x6de   : > { %3433 = vmatprep.mubr.msk.bf16.mxu1 %vm3824_vm2, %v3823_v39  ;;  %3426 = vmatpush3.bf16.msra.mxu1 %v3670_v55 }
 0x6df   : > { %3427 = vmatprep.subr.bf16.mxu1 %v3823_v39 }
 0x79d   : > { %v1754_v42 = vpop.f32.mrf.mxu1 }
 0x79e   : > { %v1755_v43 = vadd.f32 %v3113_v41, %v1754_v42 }
 0x79f   : > { %v3423_v44 = vpop.f32.mrf.mxu1 }
 0x7a0   : > { %v4279_v45 = vadd.f32 %v1755_v43, %v4129_v10  ;;  %v3671_v10 = vld [vmem:[%s4609_s11 + $0x10] sm:$0xff]  }
 0x7a1   : > { %v1757_v46 = vpop.f32.mrf.mxu1  ;;  %3428 = vmatpush3.bf16.msra.mxu1 %v3671_v10 }
 0x7a2   : > { %v1763_v47 = vsel %vm1078_vm0, %v4279_v45, 0.0  ;;  %3429 = vmatprep.subr.bf16.mxu1 %v3823_v39 }
 0x7a3   : > { %1764 = vadd.xlane.f32.xlu0 %v1763_v47  ;;  %v3424_v48 = vpop.f32.mrf.mxu1 }
 0x7a5   : > { %3430 = vmatpush3.bf16.msra.mxu1 %v3672_v56 }
 0x7a6   : > { %3431 = vmatprep.subr.bf16.mxu1 %v3823_v39 }
 0x7a9   : > { %3432 = vmatpush3.bf16.msra.mxu1 %v3673_v57 }
 0x82c   : > { %v1765_v50 = vpop.xlane.xlu0 %1764 }
 0x82d   : > { %v1766_v51 = vmul.f32 0.015625, %v1765_v50 }
 0x82f   : > { %v1767_v52 = vsub.f32 %v4279_v45, %v1766_v51  ;;  %v3127_v51 = vld [vmem:[%s4612_s14] ss:$0 sm:$0xff] }
 0x831   : > { %v1768_v53 = vmul.f32 %v1767_v52, %v1767_v52 }
 0x833   : > { %v1769_v54 = vsel %vm1078_vm0, %v1768_v53, 0.0 }
 0x834   : > { %1770 = vadd.xlane.f32.xlu1 %v1769_v54 }
 0x8bd   : > { %v1771_v58 = vpop.xlane.xlu1 %1770 }
 0x8be   : > { %v1772_v59 = vmul.f32 0.015625, %v1771_v58 }
 0x8c0   : > { %v1773_v60 = vadd.f32 1e-06, %v1772_v59 }
 0x8c2   : > { %3728 = vrsqrt.f32 %v1773_v60 }
 0x8cf   : > { %v3729_v61 = vpop.eup %3728 }
 0x8d0   : > { %v1775_v0 = vmul.f32 %v3729_v61, %v1767_v52 }
 0x8d2   : > { %v1782_v2 = vmul.f32 %v3119_v62, %v1775_v0  ;;  %v3684_v0 = vld [vmem:[%s4603_s5 + $0x74] ss:$8 sps:$4 sm:$0xff]  }
 0x8d3   : > { %2117 = vmatprep.subr.bf16.mxu1 %v3684_v0 }
 0x8d4   : > { %v1789_v3 = vadd.f32 %v3120_v1, %v1782_v2  ;;  %v3687_v1 = vld [vmem:[%s4603_s5 + $0x64] ss:$8 sps:$4 sm:$0xff]   ;;  %v3685_v2 = vld [vmem:[%s4603_s5 + $0x60] ss:$8 sps:$4 sm:$0xff]  }
 0x8d6   : > { %v1790_v4 = vpack.c.bf16 %v1789_v3, %v1789_v3  ;;  %v3690_v3 = vld [vmem:[%s4603_s5 + $0x54] ss:$8 sps:$4 sm:$0xff]  }
 0x8d8   : > { %3434 = vmatmul.mubr.msk.bf16.vlgmr.msra.gmra.mxu1 %vm1168_vm1, %v1790_v4  ;;  %v3688_v4 = vld [vmem:[%s4603_s5 + $0x50] ss:$8 sps:$4 sm:$0xff]  }
 0x8d9   : > { %2141 = vmatprep.mubr.bf16.mxu1 %v3822_v26  ;;  %v3677_v26 = vld [vmem:[%s4611_s13 + $0x20] sm:$0xff]  }
 0x8da   : > { %3444 = vmatpush3.bf16.msra.mxu0 %v3677_v26 }
 0x8db   : > { %3445 = vmatprep.subr.bf16.mxu0 %v3823_v39 }
 0x8de   : > { %3446 = vmatpush3.bf16.msra.mxu0 %v3678_v8 }
 0x8df   : > { %3447 = vmatprep.subr.bf16.mxu0 %v3823_v39 }
 0x8e2   : > { %3448 = vmatpush3.bf16.msra.mxu0 %v3679_v9 }
 0x8e3   : > { %3449 = vmatprep.subr.bf16.mxu0 %v3823_v39 }
 0x8e6   : > { %3450 = vmatpush3.bf16.msra.mxu0 %v3680_v11  ;;  %v3138_v11 = vld [vmem:[%s4650_s3 + $0x1] ss:$0 sm:$0xff] }
 0x8e7   : > { %3451 = vmatprep.subr.bf16.mxu0 %v3823_v39 }
 0x8ea   : > { %3452 = vmatpush3.bf16.msra.mxu0 %v3681_v12 }
 0x8eb   : > { %3469 = vmatprep.subr.bf16.mxu0 %v3823_v39 }
 0x998   : > { %v1867_v14 = vpop.f32.mrf.mxu1 }
 0x999   : > { %v1868_v15 = vadd.f32 %v3121_v13, %v1867_v14  ;;  %v3139_v13 = vld [vmem:[%s4602_s4 + $0x1] ss:$0 sm:$0xff] }
 0x99a   : > { %v3435_v16 = vpop.f32.mrf.mxu1 }
 0x99b   : > { %v1874_v17 = vmul.f32 0.70710677, %v1868_v15  ;;  %v1873_v46 = vmul.f32 0.5, %v1868_v15 }
 0x99c   : > { %v1870_v18 = vpop.f32.mrf.mxu1 }
 0x99d   : > { %v1875_v19 = vand.u32 2147483647, %v1874_v17  ;;  %vm1894_vm10 = vcmp.ge.f32.partialorder %v1874_v17, 0.0  ;;  %v3148_v17 = vld [vmem:[%s4604_s6 + $0x2] sm:$0x3] }
 0x99e   : > { %v3436_v20 = vpop.f32.mrf.mxu1  ;;  %v2059_v18 = vrot.slane %v3148_v17, %v1120_v40  ;;  %v2063_v40 = vrot.slane %v3148_v17, %v1124_v49 }
 0x99f   : > { %v1876_v21 = vmul.f32 0.3275911, %v1875_v19  ;;  %v1888_v23 = vsub.f32 0.0, %v1875_v19 }
 0x9a1   : > { %v1877_v22 = vadd.f32 1.0, %v1876_v21  ;;  %v1889_v24 = vmul.f32 %v1888_v23, %v1875_v19 }
 0x9a3   : > { %3730 = vrcp.f32 %v1877_v22  ;;  %v1890_v28 = vmul.f32 1.442695, %v1889_v24 }
 0x9a5   : > { %3732 = vpow2.f32 %v1890_v28 }
 0x9b0   : > { %v3731_v25 = vpop.eup %3730 }
 0x9b1   : > { %v1879_v27 = vmul.f32 1.0614054, %v3731_v25 }
 0x9b2   : > { %v3733_v37 = vpop.eup %3732 }
 0x9b3   : > { %v1880_v29 = vadd.f32 -1.4531521, %v1879_v27 }
 0x9b5   : > { %v1881_v30 = vmul.f32 %v3731_v25, %v1880_v29 }
 0x9b7   : > { %v1882_v31 = vadd.f32 1.4214138, %v1881_v30 }
 0x9b9   : > { %v1883_v32 = vmul.f32 %v3731_v25, %v1882_v31 }
 0x9bb   : > { %v1884_v33 = vadd.f32 -0.28449672, %v1883_v32 }
 0x9bd   : > { %v1885_v34 = vmul.f32 %v3731_v25, %v1884_v33 }
 0x9bf   : > { %v1886_v35 = vadd.f32 0.2548296, %v1885_v34 }
 0x9c1   : > { %v1887_v36 = vmul.f32 %v3731_v25, %v1886_v35 }
 0x9c3   : > { %v1892_v41 = vmul.f32 %v3733_v37, %v1887_v36 }
 0x9c5   : > { %v1893_v42 = vsub.f32 1.0, %v1892_v41 }
 0x9c7   : > { %v1895_v43 = vsub.f32 0.0, %v1893_v42 }
 0x9c9   : > { %v1896_v44 = vsel %vm1894_vm10, %v1893_v42, %v1895_v43 }
 0x9ca   : > { %v1897_v47 = vadd.f32 1.0, %v1896_v44 }
 0x9cc   : > { %v1898_v48 = vmul.f32 %v1897_v47, %v1873_v46 }
 0x9ce   : > { %v1899_v50 = vpack.c.bf16 %v1898_v48, %v1898_v48 }
 0x9d0   : > { %3454 = vmatmul.mubr.bf16.vlgmr.msra.gmra.mxu0 %v1899_v50 }
 0x9d1   : > { %3471 = vmatprep.mubr.msk.bf16.mxu0 %vm3824_vm2, %v3823_v39 }
 0xa90   : > { %v2005_v52 = vpop.f32.mrf.mxu0 }
 0xa91   : > { %v2006_v53 = vadd.f32 %v3127_v51, %v2005_v52 }
 0xa92   : > { %v3455_v54 = vpop.f32.mrf.mxu0 }
 0xa93   : > { %v4349_v55 = vadd.f32 %v2006_v53, %v4279_v45  ;;  %v3682_v45 = vld [vmem:[%s4603_s5 + $0x70] ss:$8 sps:$4 sm:$0xff]  }
 0xa94   : > { %v2008_v10 = vpop.f32.mrf.mxu0  ;;  %2118 = vmatpush1.bf16.msra.mxu1 %v3682_v45 }
 0xa95   : > { %v2016_v56 = vsel %vm1078_vm0, %v4349_v55, 0.0  ;;  %2119 = vmatprep.subr.bf16.mxu1 %v3687_v1 }
 0xa96   : > { %2017 = vadd.xlane.f32.xlu0 %v2016_v56  ;;  %v3456_v57 = vpop.f32.mrf.mxu0 }
 0xa98   : > { %2120 = vmatpush1.bf16.msra.mxu1 %v3685_v2 }
 0xa99   : > { %2121 = vmatprep.subr.bf16.mxu1 %v3690_v3 }
 0xa9c   : > { %2122 = vmatpush1.bf16.msra.mxu1 %v3688_v4 }
 0xa9d   : > { %2123 = vmatprep.subr.bf16.mxu1 %v3693_v5 }
 0xaa0   : > { %2124 = vmatpush1.bf16.msra.mxu1 %v3691_v6 }
 0xaa1   : > { %3457 = vmatprep.subr.bf16.mxu1 %v3823_v39 }
 0xb1f   : > { %v2018_v58 = vpop.xlane.xlu0 %2017 }
 0xb20   : > { %v2019_v59 = vmul.f32 0.015625, %v2018_v58 }
 0xb22   : > { %v2020_v60 = vsub.f32 %v4349_v55, %v2019_v59 }
 0xb24   : > { %v2021_v61 = vmul.f32 %v2020_v60, %v2020_v60 }
 0xb26   : > { %v2022_v62 = vsel %vm1078_vm0, %v2021_v61, 0.0 }
 0xb27   : > { %2023 = vadd.xlane.f32.xlu0 %v2022_v62 }
 0xbb0   : > { %v2024_v7 = vpop.xlane.xlu0 %2023 }
 0xbb1   : > { %v2025_v26 = vmul.f32 0.015625, %v2024_v7 }
 0xbb3   : > { %v2026_v8 = vadd.f32 1e-06, %v2025_v26 }
 0xbb5   : > { %3734 = vrsqrt.f32 %v2026_v8 }
 0xbc2   : > { %v3735_v9 = vpop.eup %3734 }
 0xbc3   : > { %v2028_v12 = vmul.f32 %v3735_v9, %v2020_v60 }
 0xbc5   : > { %v2035_v14 = vmul.f32 %v3138_v11, %v2028_v12 }
 0xbc7   : > { %v2042_v15 = vadd.f32 %v3139_v13, %v2035_v14 }
 0xbc9   : > { %v2043_v16 = vpack.c.bf16 %v2042_v15, %v2042_v15 }
 0xbcb   : > { %3157 = vmatmul.mubr.msk.bf16.vlgmr.msra.gmra.mxu1 %vm1168_vm1, %v2043_v16 }
 0xbcc   : > { %3459 = vmatprep.mubr.msk.bf16.mxu1 %vm3824_vm2, %v3823_v39 }
 0xc8b   : > { %v2143_v19 = vpop.f32.mrf.mxu1 }
 0xc8c   : > { %v2144_v20 = vadd.f32 %v2143_v19, %v2059_v18 }
 0xc8d   : > { %v2145_v21 = vpop.f32.mrf.mxu1 }
 0xc8e   : > { %v2150_v22 = vpack.c.bf16 %v2144_v20, %v2144_v20  ;;  %v2146_v28 = vadd.f32 %v2145_v21, %v2063_v40 }
 0xc8f   : > { %v2147_v23 = vpop.f32.mrf.mxu1 }
 0xc90   : > { %2203 = vrot.lane.b32.xlu0 %v2150_v22, %s3827_s22  ;;  %2153 = vrot.lane.b32.xlu1 %v2150_v22, %s3826_s17  ;;  %v4407_v32 = vpack.c.bf16 %v2146_v28, %v2146_v28 }
 0xc91   : > { %v2148_v24 = vpop.f32.mrf.mxu1 }
 0xc92   : > { %v2403_v34 = vand.u32 %v4407_v32, %v4202_v63 }
 0xc94   : > { %2303 = vrot.lane.b32.xlu0 %v2150_v22, %s4651_s29  ;;  %2253 = vrot.lane.b32.xlu1 %v2150_v22, %s4652_s19 }
 0xc98   : > { %2301 = vrot.lane.b32.xlu0 %v2150_v22, %s4653_s24  ;;  %2201 = vrot.lane.b32.xlu1 %v2150_v22, %s4654_s21 }
 0xc9c   : > { %2251 = vrot.lane.b32.xlu1 %v2150_v22, %s4655_s0 }
 0xd02   : > { %v2154_v25 = vpop.permute.xlu1 %2153  ;;  %v2204_v31 = vpop.permute.xlu0 %2203 }
 0xd03   : > { %v2159_v27 = vsel %vm1218_vm3, %v2154_v25, 0  ;;  %v2209_v38 = vsel %vm1218_vm3, %v2204_v31, 0 }
 0xd04   : > { %3458 = vmatpush3.bf16.xpose.msra.mxu1 %v2159_v27 }
 0xd05   : > { %3463 = vmatprep.subr.bf16.mxu1 %v3823_v39 }
 0xd06   : > { %v2254_v29 = vpop.permute.xlu1 %2253  ;;  %v2304_v35 = vpop.permute.xlu0 %2303 }
 0xd07   : > { %v2259_v30 = vsel %vm1218_vm3, %v2254_v29, 0  ;;  %v2309_v36 = vsel %vm1218_vm3, %v2304_v35, 0 }
 0xd08   : > { %3470 = vmatpush3.bf16.xpose.msra.mxu0 %v2259_v30 }
 0xd09   : > { %3481 = vmatprep.subr.bf16.mxu0 %v3823_v39 }
 0xd0a   : > { %v2202_v33 = vpop.permute.xlu1 %2201  ;;  %v2302_v37 = vpop.permute.xlu0 %2301 }
 0xd0b   : > { %3460 = vmatmul.mubr.msk.bf16.vlgmr.msra.gmra.mxu1 %vm1218_vm3, %v2150_v22 }
 0xd0c   : > { %3464 = vmatpush3.bf16.xpose.msra.mxu1 %v2209_v38  ;;  %3465 = vmatprep.mubr.msk.bf16.mxu1 %vm3824_vm2, %v3823_v39 }
 0xd0d   : > { %3475 = vmatprep.subr.bf16.mxu1 %v3823_v39 }
 0xd0e   : > { %v2252_v49 = vpop.permute.xlu1 %2251 }
 0xd0f   : > { %3472 = vmatmul.mubr.msk.bf16.vlgmr.msra.gmra.mxu0 %vm1218_vm3, %v2252_v49 }
 0xd10   : > { %3482 = vmatpush3.bf16.msra.mxu0 %v2403_v34  ;;  %3483 = vmatprep.mubr.msk.bf16.mxu0 %vm3824_vm2, %v3823_v39 }
 0xd11   : > { %3493 = vmatprep.subr.bf16.mxu0 %v3823_v39 }
 0xd13   : > { %3466 = vmatmul.mubr.msk.bf16.vlgmr.msra.gmra.mxu1 %vm1218_vm3, %v2202_v33 }
 0xd14   : > { %3476 = vmatpush3.bf16.xpose.msra.mxu1 %v2309_v36  ;;  %3477 = vmatprep.mubr.msk.bf16.mxu1 %vm3824_vm2, %v3823_v39 }
 0xd15   : > { %3487 = vmatprep.subr.bf16.mxu1 %v3823_v39 }
 0xd1b   : > { %3478 = vmatmul.mubr.msk.bf16.vlgmr.msra.gmra.mxu1 %vm1218_vm3, %v2302_v37 }
 0xd1c   : > { %3489 = vmatprep.mubr.msk.bf16.mxu1 %vm3824_vm2, %v3823_v39 }
 0xdcb   : > { %v2195_v41 = vpop.f32.mrf.mxu1 }
 0xdcc   : > { %v2351_v42 = vsel %vm1415_vm6, %v2195_v41, -inf }
 0xdcd   : > { %2352 = vmax.xlane.f32.xlu1 %v2351_v42  ;;  %v3461_v43 = vpop.f32.mrf.mxu1  ;;  %v3695_v42 = vld [vmem:[%s4605_s7 + $0x30] sm:$0xff]  }
 0xdce   : > { %v3696_v43 = vld [vmem:[%s4605_s7 + $0x28] sm:$0xff]  }
 0xdcf   : > { %v2198_v44 = vpop.f32.mrf.mxu1  ;;  %v2295_v46 = vpop.f32.mrf.mxu0 }
 0xdd0   : > { %v2357_v56 = vsel %vm1415_vm6, %v2295_v46, -inf }
 0xdd1   : > { %v3462_v47 = vpop.f32.mrf.mxu1  ;;  %v3473_v48 = vpop.f32.mrf.mxu0 }
 0xdd2   : > { %v3697_v47 = vld [vmem:[%s4605_s7 + $0x20] sm:$0xff]  }
 0xdd3   : > { %v2245_v50 = vpop.f32.mrf.mxu1  ;;  %v2298_v51 = vpop.f32.mrf.mxu0 }
 0xdd4   : > { %v2354_v52 = vsel %vm1415_vm6, %v2245_v50, -inf }
 0xdd5   : > { %2355 = vmax.xlane.f32.xlu0 %v2354_v52  ;;  %v3467_v53 = vpop.f32.mrf.mxu1  ;;  %v3474_v54 = vpop.f32.mrf.mxu0 }
 0xdd7   : > { %v2248_v10 = vpop.f32.mrf.mxu1 }
 0xdd9   : > { %v3468_v57 = vpop.f32.mrf.mxu1  ;;  %2358 = vmax.xlane.f32.xlu0 %v2357_v56 }
 0xddb   : > { %v2345_v58 = vpop.f32.mrf.mxu1 }
 0xddc   : > { %v2360_v59 = vsel %vm1415_vm6, %v2345_v58, -inf }
 0xddd   : > { %2361 = vmax.xlane.f32.xlu1 %v2360_v59  ;;  %v3479_v60 = vpop.f32.mrf.mxu1 }
 0xddf   : > { %v2348_v61 = vpop.f32.mrf.mxu1 }
 0xde1   : > { %v3480_v62 = vpop.f32.mrf.mxu1 }
 0xdee   : > { %2494 = vrot.lane.b32.xlu1 %v4407_v32, %s4655_s0  ;;  %s3226_s0 = sshll.u32 %s3945_s28, 4 }
 0xdef   : > { %s2978_s26 = scalar_lea.hbm %s4656_s27, %s3226_s0 }
 0xe56   : > { %v2353_v0 = vpop.xlane.xlu1 %2352 }
 0xe57   : > { %v2363_v45 = vsub.f32 %v2195_v41, %v2353_v0 }
 0xe59   : > { %v2367_v1 = vmul.f32 1.442695, %v2363_v45 }
 0xe5b   : > { %3736 = vpow2.f32 %v2367_v1 }
 0xe5e   : > { %v2356_v2 = vpop.xlane.xlu0 %2355 }
 0xe5f   : > { %v2364_v3 = vsub.f32 %v2245_v50, %v2356_v2 }
 0xe61   : > { %v2369_v4 = vmul.f32 1.442695, %v2364_v3 }
 0xe62   : > { %v2359_v5 = vpop.xlane.xlu0 %2358 }
 0xe63   : > { %3738 = vpow2.f32 %v2369_v4  ;;  %v2365_v6 = vsub.f32 %v2295_v46, %v2359_v5 }
 0xe65   : > { %v2371_v7 = vmul.f32 1.442695, %v2365_v6  ;;  %v3175_v6 = vld [vmem:[%s4606_s8 + $0x1] ss:$0 sm:$0xff] }
 0xe66   : > { %v2362_v26 = vpop.xlane.xlu1 %2361 }
 0xe67   : > { %3740 = vpow2.f32 %v2371_v7  ;;  %v2366_v8 = vsub.f32 %v2345_v58, %v2362_v26 }
 0xe68   : > { %v3737_v9 = vpop.eup %3736 }
 0xe69   : > { %v2373_v11 = vmul.f32 1.442695, %v2366_v8  ;;  %v2375_v12 = vsel %vm1415_vm6, %v3737_v9, 0.0 }
 0xe6a   : > { %2376 = vadd.xlane.f32.xlu0 %v2375_v12  ;;  %v2495_v20 = vpop.permute.xlu1 %2494 }
 0xe6b   : > { %3742 = vpow2.f32 %v2373_v11  ;;  %v2500_v29 = vand.u32 %v2495_v20, %v4202_v63  ;;  %v3700_v20 = vld [vmem:[%s4609_s11 + $0x28] sm:$0xff]  }
 0xe70   : > { %v3739_v13 = vpop.eup %3738 }
 0xe71   : > { %v2378_v14 = vsel %vm1415_vm6, %v3739_v13, 0.0 }
 0xe72   : > { %2379 = vadd.xlane.f32.xlu1 %v2378_v14 }
 0xe74   : > { %v3741_v15 = vpop.eup %3740 }
 0xe75   : > { %v2381_v16 = vsel %vm1415_vm6, %v3741_v15, 0.0 }
 0xe76   : > { %2382 = vadd.xlane.f32.xlu0 %v2381_v16 }
 0xe78   : > { %v3743_v17 = vpop.eup %3742 }
 0xe79   : > { %v2384_v18 = vsel %vm1415_vm6, %v3743_v17, 0.0 }
 0xe7a   : > { %2385 = vadd.xlane.f32.xlu1 %v2384_v18 }
 0xe8b   : > { %2542 = vrot.lane.b32.xlu1 %v4407_v32, %s4653_s24  ;;  %s539_s24 = sand.u32 1, %s3812_s25  }
 0xe8c   : > { %2446 = vrot.lane.b32.xlu0 %v4407_v32, %s4654_s21  ;;  %s540_s17 = scalar_lea.vmem [#allocation2], %s539_s24  ;;  %s2968_s3 = scalar_lea.sflag [#allocation3], %s539_s24 }
 0xe8d   : > { %s2980_s20 = sshll.u32 %s540_s17, 4  ;;  %s2981_s20 = int_to_ptr.vmem [resolvable:$true] %s2980_s20 }
 0xe8e   : > { %s3760_s21 = scalar_lea.vmem %s2981_s20, 16 }
 0xe8f   : > { %p3761_p11 = scmp.ne.s32.totalorder %s2981_s20, %s3760_s21 }
 0xe91   : > { %p3762_p12 = pnand %p3761_p11, %p3962_p5 }
 0xe93   : > { %p3763_p13 = pneg %p3762_p12 }
 0xef3   : > { %v2377_v19 = vpop.xlane.xlu0 %2376 }
 0xef4   : > { %3744 = vrcp.f32 %v2377_v19  ;;  %v3698_v19 = vld [vmem:[%s4609_s11 + $0x38] sm:$0xff]  }
 0xefb   : > { %v2380_v21 = vpop.xlane.xlu1 %2379 }
 0xefc   : > { %3746 = vrcp.f32 %v2380_v21  ;;  %v3701_v21 = vld [vmem:[%s4609_s11 + $0x20] sm:$0xff]  }
 0xeff   : > { %v2383_v22 = vpop.xlane.xlu0 %2382 }
 0xf00   : > { %3748 = vrcp.f32 %v2383_v22 }
 0xf01   : > { %v3745_v23 = vpop.eup %3744 }
 0xf02   : > { %v2391_v24 = vmul.f32 %v3745_v23, %v3737_v9 }
 0xf03   : > { %v2447_v40 = vpop.permute.xlu0 %2446  ;;  %v2386_v25 = vpop.xlane.xlu1 %2385 }
 0xf04   : > { %v2452_v27 = vand.u32 %v2447_v40, %v4202_v63  ;;  %3750 = vrcp.f32 %v2386_v25  ;;  %v2395_v28 = vpack.c.bf16 %v2391_v24, %v2391_v24  ;;  %v3183_v25 = vld [vmem:[%s4607_s9 + $0x1] ss:$0 sm:$0xff] }
 0xf06   : > { %3484 = vmatmul.mubr.msk.bf16.vlgmr.msra.gmra.mxu0 %vm1464_vm7, %v2395_v28  ;;  %3488 = vmatpush3.bf16.msra.mxu1 %v2452_v27  ;;  %v3184_v28 = vld [vmem:[%s4608_s10 + $0x1] ss:$0 sm:$0xff] }
 0xf07   : > { %3494 = vmatpush3.bf16.msra.mxu0 %v2500_v29  ;;  %3499 = vmatprep.subr.bf16.mxu1 %v3823_v39  ;;  %v2543_v31 = vpop.permute.xlu1 %2542 }
 0xf08   : > { %3495 = vmatprep.mubr.msk.bf16.mxu0 %vm3824_vm2, %v3823_v39  ;;  %3505 = vmatprep.subr.bf16.mxu0 %v3823_v39  ;;  %v2548_v49 = vand.u32 %v2543_v31, %v4202_v63  ;;  %v3694_v63 = vld [vmem:[%s4605_s7 + $0x38] sm:$0xff]  }
 0xf09   : > { %v3747_v30 = vpop.eup %3746 }
 0xf0a   : > { %v2392_v32 = vmul.f32 %v3747_v30, %v3739_v13 }
 0xf0c   : > { %v2396_v33 = vpack.c.bf16 %v2392_v32, %v2392_v32  ;;  %v3702_v32 = vld [vmem:[%s4611_s13 + $0x78] sm:$0xff]  }
 0xf0d   : > { %v3749_v38 = vpop.eup %3748 }
 0xf0e   : > { %3490 = vmatmul.mubr.msk.bf16.vlgmr.msra.gmra.mxu1 %vm1464_vm7, %v2396_v33  ;;  %v2393_v34 = vmul.f32 %v3749_v38, %v3741_v15  ;;  %v3703_v33 = vld [vmem:[%s4611_s13 + $0x70] sm:$0xff]   ;;  %v3704_v38 = vld [vmem:[%s4611_s13 + $0x68] sm:$0xff]  }
 0xf0f   : > { %3500 = vmatpush3.bf16.msra.mxu1 %v2548_v49  ;;  %3501 = vmatprep.mubr.msk.bf16.mxu1 %vm3824_vm2, %v3823_v39  ;;  %v3705_v49 = vld [vmem:[%s4611_s13 + $0x60] sm:$0xff]  }
 0xf10   : > { %v2397_v35 = vpack.c.bf16 %v2393_v34, %v2393_v34  ;;  %3517 = vmatprep.subr.bf16.mxu1 %v3823_v39  ;;  %v3706_v34 = vld [vmem:[%s4611_s13 + $0x58] sm:$0xff]  }
 0xf11   : > { %v3751_v36 = vpop.eup %3750 }
 0xf12   : > { %3496 = vmatmul.mubr.msk.bf16.vlgmr.msra.gmra.mxu0 %vm1464_vm7, %v2397_v35  ;;  %v2394_v37 = vmul.f32 %v3751_v36, %v3743_v17  ;;  %v3707_v35 = vld [vmem:[%s4611_s13 + $0x50] sm:$0xff]   ;;  %v3708_v36 = vld [vmem:[%s4611_s13 + $0x48] sm:$0xff]  }
 0xf13   : > { %3513 = vmatprep.mubr.msk.bf16.mxu0 %vm3824_vm2, %v3823_v39  ;;  %3506 = vmatpush3.bf16.msra.mxu0 %v3694_v63 }
 0xf14   : > { %v2398_v41 = vpack.c.bf16 %v2394_v37, %v2394_v37  ;;  %3507 = vmatprep.subr.bf16.mxu0 %v3823_v39  ;;  %v3709_v37 = vld [vmem:[%s4611_s13 + $0x40] sm:$0xff]  }
 0xf16   : > { %3502 = vmatmul.mubr.msk.bf16.vlgmr.msra.gmra.mxu1 %vm1464_vm7, %v2398_v41  ;;  %v3194_v41 = vld [vmem:[%s4610_s12 + $0x1] ss:$0 sm:$0xff] }
 0xf17   : > { %3525 = vmatprep.mubr.msk.bf16.mxu1 %vm3824_vm2, %v3823_v39  ;;  %3508 = vmatpush3.bf16.msra.mxu0 %v3695_v42 }
 0xf18   : > { %3509 = vmatprep.subr.bf16.mxu0 %v3823_v39  ;;  %3518 = vmatpush3.bf16.msra.mxu1 %v3698_v19 }
 0xf19   : > { %3519 = vmatprep.subr.bf16.mxu1 %v3823_v39 }
 0xf1b   : > { %3510 = vmatpush3.bf16.msra.mxu0 %v3696_v43 }
 0xf1c   : > { %3511 = vmatprep.subr.bf16.mxu0 %v3823_v39 }
 0xf1f   : > { %3512 = vmatpush3.bf16.msra.mxu0 %v3697_v47 }
 0xf20   : > { %3529 = vmatprep.subr.bf16.mxu0 %v3823_v39 }
 0xfc6   : > { %v2439_v44 = vpop.f32.mrf.mxu0 }
 0xfc8   : > { %v3485_v46 = vpop.f32.mrf.mxu0 }
 0xfca   : > { %v2442_v48 = vpop.f32.mrf.mxu0 }
 0xfcc   : > { %v3486_v50 = vpop.f32.mrf.mxu0 }
 0xfce   : > { %v2488_v51 = vpop.f32.mrf.mxu1 }
 0xfcf   : > { %2591 = vrot.lane.b32.xlu0 %v2488_v51, %s4651_s29 }
 0xfd0   : > { %v3491_v52 = vpop.f32.mrf.mxu1 }
 0xfd2   : > { %v2491_v53 = vpop.f32.mrf.mxu1  ;;  %v2536_v54 = vpop.f32.mrf.mxu0 }
 0xfd3   : > { %2595 = vrot.lane.b32.xlu1 %v2536_v54, %s4652_s19 }
 0xfd4   : > { %v3492_v10 = vpop.f32.mrf.mxu1  ;;  %v3497_v56 = vpop.f32.mrf.mxu0 }
 0xfd6   : > { %v2539_v57 = vpop.f32.mrf.mxu0  ;;  %v2584_v58 = vpop.f32.mrf.mxu1 }
 0xfd7   : > { %2599 = vrot.lane.b32.xlu0 %v2584_v58, %s3827_s22  ;;  %s3833_s22 = smov [#allocation2]  }
 0xfd8   : > { %v3498_v59 = vpop.f32.mrf.mxu0  ;;  %v3503_v60 = vpop.f32.mrf.mxu1  ;;  %s3764_s29 = sshll.u32 %s3833_s22, 4  ;;  %s3765_s29 = int_to_ptr.vmem [resolvable:$false] %s3764_s29 }
 0xfd9   : > { %s3766_s28 = scalar_lea.vmem %s3765_s29, 32  ;;  %p3767_p0 = scmp.lt.s32.totalorder %s2981_s20, %s3765_s29 }
 0xfda   : > { %v2587_v61 = vpop.f32.mrf.mxu1  ;;  %p3768_p1 = scmp.lt.s32.totalorder %s3766_s28, %s3760_s21 }
 0xfdc   : > { %v3504_v62 = vpop.f32.mrf.mxu1  ;;  %p3769_p2 = por %p3768_p1, %p3767_p0 }
 0xfde   : > { %p3770_p3 = pnand %p3769_p2, %p3763_p13 }
0x1041   : > { %v2592_v0 = vpop.permute.xlu0 %2591 }
0x1042   : > { %v2602_v1 = vsel %vm1218_vm3, %v2439_v44, %v2592_v0 }
0x1045   : > { %v2596_v45 = vpop.permute.xlu1 %2595 }
0x1046   : > { %v2603_v2 = vsel %vm1673_vm8, %v2602_v1, %v2596_v45 }
0x1049   : > { %v2600_v3 = vpop.permute.xlu0 %2599 }
0x104a   : > { %v2604_v4 = vsel %vm1675_vm9, %v2603_v2, %v2600_v3 }
0x104b   : > { %v2605_v5 = vpack.c.bf16 %v2604_v4, %v2604_v4 }
0x104d   : > { %3514 = vmatmul.mubr.msk.bf16.vlgmr.msra.gmra.mxu0 %vm1168_vm1, %v2605_v5 }
0x104e   : > { %3545 = vmatprep.mubr.msk.bf16.mxu0 %vm3824_vm2, %v3823_v39  ;;  %3530 = vmatpush3.bf16.msra.mxu0 %v3702_v32 }
0x104f   : > { %3531 = vmatprep.subr.bf16.mxu0 %v3823_v39 }
0x1052   : > { %3532 = vmatpush3.bf16.msra.mxu0 %v3703_v33 }
0x1053   : > { %3533 = vmatprep.subr.bf16.mxu0 %v3823_v39 }
0x1056   : > { %3534 = vmatpush3.bf16.msra.mxu0 %v3704_v38 }
0x1057   : > { %3535 = vmatprep.subr.bf16.mxu0 %v3823_v39 }
0x105a   : > { %3536 = vmatpush3.bf16.msra.mxu0 %v3705_v49 }
0x105b   : > { %3537 = vmatprep.subr.bf16.mxu0 %v3823_v39 }
0x105e   : > { %3538 = vmatpush3.bf16.msra.mxu0 %v3706_v34 }
0x105f   : > { %3539 = vmatprep.subr.bf16.mxu0 %v3823_v39 }
0x1062   : > { %3540 = vmatpush3.bf16.msra.mxu0 %v3707_v35 }
0x1063   : > { %3541 = vmatprep.subr.bf16.mxu0 %v3823_v39 }
0x1066   : > { %3542 = vmatpush3.bf16.msra.mxu0 %v3708_v36 }
0x1067   : > { %3543 = vmatprep.subr.bf16.mxu0 %v3823_v39 }
0x106a   : > { %3544 = vmatpush3.bf16.msra.mxu0 %v3709_v37 }
0x110d   : > { %v2684_v7 = vpop.f32.mrf.mxu0 }
0x110e   : > { %v2685_v26 = vadd.f32 %v3175_v6, %v2684_v7 }
0x110f   : > { %v3515_v8 = vpop.f32.mrf.mxu0 }
0x1110   : > { %v4489_v9 = vadd.f32 %v2685_v26, %v4349_v55  ;;  %v3699_v55 = vld [vmem:[%s4609_s11 + $0x30] sm:$0xff]   ;;  %v3217_v8 = vld [vmem:[%s4612_s14 + $0x1] ss:$0 sm:$0xff] }
0x1111   : > { %v2687_v11 = vpop.f32.mrf.mxu0  ;;  %3520 = vmatpush3.bf16.msra.mxu1 %v3699_v55 }
0x1112   : > { %v2695_v12 = vsel %vm1078_vm0, %v4489_v9, 0.0  ;;  %3521 = vmatprep.subr.bf16.mxu1 %v3823_v39 }
0x1113   : > { %2696 = vadd.xlane.f32.xlu1 %v2695_v12  ;;  %v3516_v13 = vpop.f32.mrf.mxu0 }
0x1115   : > { %3522 = vmatpush3.bf16.msra.mxu1 %v3700_v20 }
0x1116   : > { %3523 = vmatprep.subr.bf16.mxu1 %v3823_v39 }
0x1119   : > { %3524 = vmatpush3.bf16.msra.mxu1 %v3701_v21 }
0x119c   : > { %v2697_v14 = vpop.xlane.xlu1 %2696 }
0x119d   : > { %v2698_v15 = vmul.f32 0.015625, %v2697_v14 }
0x119f   : > { %v2699_v16 = vsub.f32 %v4489_v9, %v2698_v15 }
0x11a1   : > { %v2700_v17 = vmul.f32 %v2699_v16, %v2699_v16 }
0x11a3   : > { %v2701_v18 = vsel %vm1078_vm0, %v2700_v17, 0.0 }
0x11a4   : > { %2702 = vadd.xlane.f32.xlu0 %v2701_v18 }
0x122d   : > { %v2703_v22 = vpop.xlane.xlu0 %2702 }
0x122e   : > { %v2704_v23 = vmul.f32 0.015625, %v2703_v22 }
0x1230   : > { %v2705_v24 = vadd.f32 1e-06, %v2704_v23 }
0x1232   : > { %3752 = vrsqrt.f32 %v2705_v24 }
0x123f   : > { %v3753_v40 = vpop.eup %3752 }
0x1240   : > { %v2707_v27 = vmul.f32 %v3753_v40, %v2699_v16  ;;  %v2948_v40 = vld [vmem:[%s4613_s15] sm:$0x1] }
0x1242   : > { %v2714_v29 = vmul.f32 %v3183_v25, %v2707_v27  ;;  %v2949_v27 = vld [vmem:[%s4614_s16] sm:$0x1] }
0x1244   : > { %v2721_v30 = vadd.f32 %v3184_v28, %v2714_v29 }
0x1246   : > { %v2722_v31 = vpack.c.bf16 %v2721_v30, %v2721_v30 }
0x1248   : > { %3526 = vmatmul.mubr.msk.bf16.vlgmr.msra.gmra.mxu1 %vm1168_vm1, %v2722_v31 }
0x1308   : > { %v2801_v63 = vpop.f32.mrf.mxu1 }
0x1309   : > { %v2802_v42 = vadd.f32 %v3194_v41, %v2801_v63 }
0x130a   : > { %v3527_v43 = vpop.f32.mrf.mxu1 }
0x130b   : > { %v2808_v44 = vmul.f32 0.70710677, %v2802_v42  ;;  %v2807_v5 = vmul.f32 0.5, %v2802_v42 }
0x130c   : > { %v2804_v46 = vpop.f32.mrf.mxu1 }
0x130d   : > { %v2809_v47 = vand.u32 2147483647, %v2808_v44  ;;  %vm2828_vm11 = vcmp.ge.f32.partialorder %v2808_v44, 0.0 }
0x130e   : > { %v3528_v48 = vpop.f32.mrf.mxu1 }
0x130f   : > { %v2810_v50 = vmul.f32 0.3275911, %v2809_v47  ;;  %v2822_v39 = vsub.f32 0.0, %v2809_v47 }
0x1311   : > { %v2811_v51 = vadd.f32 1.0, %v2810_v50  ;;  %v2823_v52 = vmul.f32 %v2822_v39, %v2809_v47 }
0x1313   : > { %3754 = vrcp.f32 %v2811_v51  ;;  %v2824_v10 = vmul.f32 1.442695, %v2823_v52 }
0x1315   : > { %3756 = vpow2.f32 %v2824_v10 }
0x1320   : > { %v3755_v53 = vpop.eup %3754 }
0x1321   : > { %v2813_v54 = vmul.f32 1.0614054, %v3755_v53 }
0x1322   : > { %v3757_v45 = vpop.eup %3756 }
0x1323   : > { %v2814_v56 = vadd.f32 -1.4531521, %v2813_v54 }
0x1325   : > { %v2815_v57 = vmul.f32 %v3755_v53, %v2814_v56 }
0x1327   : > { %v2816_v58 = vadd.f32 1.4214138, %v2815_v57 }
0x1329   : > { %v2817_v59 = vmul.f32 %v3755_v53, %v2816_v58 }
0x132b   : > { %v2818_v60 = vadd.f32 -0.28449672, %v2817_v59 }
0x132d   : > { %v2819_v61 = vmul.f32 %v3755_v53, %v2818_v60 }
0x132f   : > { %v2820_v62 = vadd.f32 0.2548296, %v2819_v61 }
0x1331   : > { %v2821_v0 = vmul.f32 %v3755_v53, %v2820_v62 }
0x1333   : > { %v2826_v1 = vmul.f32 %v3757_v45, %v2821_v0 }
0x1335   : > { %v2827_v2 = vsub.f32 1.0, %v2826_v1 }
0x1337   : > { %v2829_v3 = vsub.f32 0.0, %v2827_v2 }
0x1339   : > { %v2830_v4 = vsel %vm2828_vm11, %v2827_v2, %v2829_v3 }
0x133a   : > { %v2831_v6 = vadd.f32 1.0, %v2830_v4 }
0x133c   : > { %v2832_v7 = vmul.f32 %v2831_v6, %v2807_v5 }
0x133e   : > { %v2833_v26 = vpack.c.bf16 %v2832_v7, %v2832_v7 }
0x1340   : > { %3546 = vmatmul.mubr.bf16.vlgmr.msra.gmra.mxu0 %v2833_v26 }
0x1400   : > { %v2941_v11 = vpop.f32.mrf.mxu0 }
0x1401   : > { %v2942_v12 = vadd.f32 %v3217_v8, %v2941_v11 }
0x1402   : > { %v3547_v13 = vpop.f32.mrf.mxu0 }
0x1403   : > { %v2947_v14 = vadd.f32 %v2942_v12, %v4489_v9 }
0x1404   : > { %v2944_v15 = vpop.f32.mrf.mxu0 }
0x1405   : > { %v2951_v16 = vsel %vm2950_vm12, %v2947_v14, 0.0 }
0x1406   : > { %2952 = vadd.xlane.f32.xlu0 %v2951_v16  ;;  %v3548_v17 = vpop.f32.mrf.mxu0 }
0x148f   : > { %v2953_v18 = vpop.xlane.xlu0 %2952 }
0x1490   : > { %v2954_v19 = vmul.f32 0.015625, %v2953_v18 }
0x1492   : > { %v2955_v55 = vsub.f32 %v2947_v14, %v2954_v19 }
0x1494   : > { %v2956_v20 = vmul.f32 %v2955_v55, %v2955_v55 }
0x1496   : > { %v2957_v21 = vsel %vm2950_vm12, %v2956_v20, 0.0 }
0x1497   : > { %2958 = vadd.xlane.f32.xlu1 %v2957_v21 }
0x1520   : > { %v2959_v22 = vpop.xlane.xlu1 %2958 }
0x1521   : > { %v2960_v23 = vmul.f32 0.015625, %v2959_v22 }
0x1523   : > { %v2961_v24 = vadd.f32 1e-06, %v2960_v23 }
0x1525   : > { %3758 = vrsqrt.f32 %v2961_v24 }
0x1532   : > { %v3759_v9 = vpop.eup %3758 }
0x1533   : > { %v2963_v25 = vmul.f32 %v3759_v9, %v2955_v55 }
0x1535   : > { %v2964_v28 = vmul.f32 %v2963_v25, %v2948_v40 }
0x1537   : > { %v2965_v29 = vadd.f32 %v2964_v28, %v2949_v27 }
0x1539   : > { %2966 = vst.msk [vmem:[%s540_s17] sm:$0x1] %vm2950_vm12, %v2965_v29 }
0x153a   : > { %3773 = shalt.err (!%p3770_p3)
}
0x153b   : > { %s3774_s19 = scalar_lea.hbm %s2978_s26, 16  ;;  %s3778_s17 = scalar_lea.hbm %s4657_s2, 32 }
0x153c   : > { %p3775_p4 = scmp.ne.s32.totalorder %s2978_s26, %s3774_s19  ;;  %p3779_p9 = scmp.lt.s32.totalorder %s2978_s26, %s4657_s2 }
0x153d   : > { %p3780_p10 = scmp.lt.s32.totalorder %s3778_s17, %s3774_s19 }
0x153e   : > { %p3776_p7 = pnand %p3775_p4, %p3962_p5 }
0x153f   : > { %p3781_p11 = por %p3780_p10, %p3779_p9 }
0x1540   : > { %p3777_p8 = pneg %p3776_p7 }
0x1542   : > { %p3782_p12 = pnand %p3781_p11, %p3777_p8 }
0x1544   : > { %3785 = shalt.err (!%p3782_p12)
}
0x1545   : > { %3550 = dma.vmem_to_hbm [thread:$0]  (%p3962_p5), %s2981_s20, 16, %s2978_s26, %s2968_s3  }
0x1546 PF: > { %s4658_s27 = sld [smem:[#allocation7_spill]] }
0x1547   : > { %s4659_s21 = sld [smem:[#allocation5_spill]] }
0x154c   : > { %p3556_p13 = scmp.ge.s32.totalorder %s4658_s27, 2 }
0x154d   : > { %s2992_s29 = sand.u32 1, %s4659_s21  }
0x154e   : > { %p3553_p0 = pnand %p3556_p13, %p3966_p6  ;;  %s2993_s28 = scalar_lea.sflag [#allocation3], %s2992_s29 }
0x1550   : > { %p3554_p1 = pneg %p3553_p0 }
0x1552   : > { %3803 = dma.done.wait (%p3554_p1), %s2993_s28, 16  }
0x1553   : > { %3805 = vsyncadd (%p3554_p1), %s2993_s28, 4294967280  ;;  %s4661_s27 = sld [smem:[#allocation8_spill]]  ;;  %s4664_s24 = smov %s3812_s25 }
0x1554   : > { %s4662_s19 = sld [smem:[#allocation6_spill]] }
0x1555   : > { %s4663_s26 = sld [smem:[#allocation9_spill]] }
0x1559   : > { %p27_p2 = scmp.ge.s32.totalorder %s4661_s27, 4  }
0x155a   : > { %s4665_s25 = smov %s4662_s19 }
0x155b   :  { %29 = sbr.rel (!%p27_p2) target bundleno = 9 (0x9), region = 135 }
0x1560   :  { %2997 = vsyncpa [#allocation3], 1 }
0x1561   :  { %2999 = vsyncpa [#allocation3 + $0x1], 1 }

</bundles_post_ra>
